<compile_context>
chip_gen: v7x
topology: tpu7x:2x2x1
jax: 0.10.0
libtpu: 0.0.40
codegen_flags: <defaults>
</compile_context>

<pallas_src>
import functools

import jax
import jax.numpy as jnp
from jax.experimental import pallas as pl
from jax.experimental.pallas import tpu as pltpu  # noqa: F401  (TPU backend)

# ----- config flags mirroring the module-level globals in cepn.py -----
use_pos_tags = True
use_char_feature = True
use_sent_boundary_tag = True

# ----- small synthetic dims -----
B = 2                                   # batch
S = 8                                   # BERT seq len (incl. CLS)
W = S - 1                               # word positions after dropping CLS
H = 32                                  # BERT hidden dim
N_HEADS = 4
D_HEAD = H // N_HEADS
FFN = 64
VOCAB = 100
POS_VOCAB = 10
POS_DIM = 8
CHAR_VOCAB = 20
CHAR_EMBED_DIM = 8
CHAR_FEATURE_DIM = 8
CONV_FILTER_SIZE = 3
MAX_WORD_LEN = 6
POOL_K = MAX_WORD_LEN + CONV_FILTER_SIZE - 1       # MaxPool1d kernel == stride
LC = W * POOL_K                                     # conv output length (56)
CHAR_LEN = LC + CONV_FILTER_SIZE - 1                # so pooled length == W
BOUND_VOCAB = 5
BOUND_DIM = 4

FEAT_DIM = ((POS_DIM if use_pos_tags else 0)
            + (BOUND_DIM if use_sent_boundary_tag else 0))
OUT_DIM = (H + FEAT_DIM + (CHAR_FEATURE_DIM if use_char_feature else 0))
OUT_PAD = 128                                       # lane-padded output slab width

# ----- static row layout of the packed constant slab (all 8-row aligned) -----
ROW_P_WORD = 0                                      # (H, 128) identity @ cols 0..H-1
ROW_P_FEATS = ROW_P_WORD + H                        # (FEAT_DIM, 128) pos/bound placement
ROW_P_CHAR = ROW_P_FEATS + 16                       # (F, 128) char-feature placement
ROW_CONV_W = ROW_P_CHAR + CHAR_FEATURE_DIM          # (3E, F) flattened conv weight
ROW_SEL_W = ROW_CONV_W + 3 * CHAR_EMBED_DIM         # (B*W, B*S) drop-CLS row selector
ROW_SEL_CLS = ROW_SEL_W + 16                        # (B, B*S) CLS row selector
ROW_VEC = ROW_SEL_CLS + 8                           # bias / LayerNorm vectors
N_VEC = 12
CONST_ROWS = ROW_VEC + 16                           # 120 rows total


# ============================ fused Pallas kernel ============================

def _layernorm(x, g, b, eps=1e-12):
    mu = jnp.mean(x, axis=-1, keepdims=True)
    var = jnp.mean(jnp.square(x - mu), axis=-1, keepdims=True)
    return (x - mu) * jax.lax.rsqrt(var + eps) * g + b


def _fused_encoder_kernel(x0_ref, mask_ref, feats_ref, chars_ref,
                          w_stack_ref, w_ffn2_ref, const_ref, out_ref):
    f32 = jnp.float32

    def vec(r, width):                                # one bias/LN row, lanes 0..width
        return const_ref[ROW_VEC + r:ROW_VEC + r + 1, 0:width]

    # ---------------- synthetic 1-layer BERT ----------------
    x = _layernorm(x0_ref[...], vec(0, H), vec(1, H))                 # (B*S, H)

    # Fused QKV projection: ONE (B*S,H)@(H,3H) MXU push replaces 12 per-head dots.
    qkv = (jnp.dot(x, w_stack_ref[:, 0:3 * H], preferred_element_type=f32)
           + vec(6, 3 * H))                                           # (B*S, 3H)

    mask = mask_ref[...]                                              # (B, 1, S)
    scale = 1.0 / float(D_HEAD) ** 0.5
    ctx_heads = []
    # 4-iteration Python loop; per-head live values are (B*S, D_HEAD)=(16,8), so
    # vreg pressure is negligible (fori_loop would need dynamic lane slicing).
    for h in range(N_HEADS):
        q = qkv[:, 0 * H + h * D_HEAD:0 * H + (h + 1) * D_HEAD].reshape(B, S, D_HEAD)
        k = qkv[:, 1 * H + h * D_HEAD:1 * H + (h + 1) * D_HEAD].reshape(B, S, D_HEAD)
        v = qkv[:, 2 * H + h * D_HEAD:2 * H + (h + 1) * D_HEAD].reshape(B, S, D_HEAD)
        s = jnp.einsum("bqd,bkd->bqk", q, k,
                       preferred_element_type=f32) * scale + mask
        s = s - jnp.max(s, axis=-1, keepdims=True)
        p = jnp.exp(s)
        p = p / jnp.sum(p, axis=-1, keepdims=True)        # exact softmax (parity)
        ctx_heads.append(jnp.einsum("bqk,bkd->bqd", p, v,
                                    preferred_element_type=f32).reshape(B * S, D_HEAD))
    ctx = jnp.concatenate(ctx_heads, axis=-1)                          # (B*S, H)
    attn = (jnp.dot(ctx, w_stack_ref[:, 3 * H:4 * H], preferred_element_type=f32)
            + vec(7, H))                                               # single W_o dot
    x = _layernorm(x + attn, vec(2, H), vec(3, H))

    # FFN.  TODO(synk): jax.nn.gelu is the tanh approximation; real BERT uses erf GELU.
    h1 = jax.nn.gelu(jnp.dot(x, w_stack_ref[:, 4 * H:4 * H + FFN],
                             preferred_element_type=f32) + vec(8, FFN))
    h2 = jnp.dot(h1, w_ffn2_ref[...], preferred_element_type=f32) + vec(9, H)
    x = _layernorm(x + h2, vec(4, H), vec(5, H))                       # (B*S, H)

    p_word = const_ref[ROW_P_WORD:ROW_P_WORD + H, :]                   # (H, 128)

    # ---- pooler: tanh(W_pool @ CLS), folded into the output slab rows B*W.. ----
    t = jnp.tanh(jnp.dot(x, w_stack_ref[:, 4 * H + FFN:5 * H + FFN],
                         preferred_element_type=f32) + vec(10, H))     # (B*S, H)
    cls = jnp.dot(const_ref[ROW_SEL_CLS:ROW_SEL_CLS + B, 0:B * S], t,
                  preferred_element_type=f32)                          # (B, H)
    pooled_slab = jnp.dot(cls, p_word, preferred_element_type=f32)     # (B, 128)

    # ---- word rows: concat([bert|pos|char|bound]) assembled on the MXU ----
    words = jnp.dot(const_ref[ROW_SEL_W:ROW_SEL_W + B * W, 0:B * S], x,
                    preferred_element_type=f32)                        # (B*W, H)
    slab = jnp.dot(words, p_word, preferred_element_type=f32)          # (B*W, 128)
    if FEAT_DIM > 0:
        slab = slab + jnp.dot(feats_ref[...],
                              const_ref[ROW_P_FEATS:ROW_P_FEATS + FEAT_DIM, :],
                              preferred_element_type=f32)
    if use_char_feature:
        # ONE batched conv matmul (im2col done in the wrapper), then a single
        # reshape-maxpool over POOL_K-row groups (replaces 14 slice-max + concats).
        c = (jnp.dot(chars_ref[...],
                     const_ref[ROW_CONV_W:ROW_CONV_W + 3 * CHAR_EMBED_DIM,
                               0:CHAR_FEATURE_DIM],
                     preferred_element_type=f32)
             + vec(11, CHAR_FEATURE_DIM))                              # (B*LC, F)
        fb = jnp.max(c.reshape(B * W, POOL_K, CHAR_FEATURE_DIM), axis=1)
        slab = slab + jnp.dot(jnp.tanh(fb),
                              const_ref[ROW_P_CHAR:ROW_P_CHAR + CHAR_FEATURE_DIM, :],
                              preferred_element_type=f32)

    # single lane-dense (B*W + B, 128) store
    out_ref[...] = jnp.concatenate([slab, pooled_slab], axis=0)


# ============================ parameters ============================

def init_params(key):
    ks = jax.random.split(key, 16)

    def nrm(k, shape):
        return (0.02 * jax.random.normal(k, shape)).astype(jnp.float32)

    p = {}
    # synthetic 1-layer BERT
    p["word_emb"] = nrm(ks[0], (VOCAB, H))
    p["pos_emb_bert"] = nrm(ks[1], (S, H))
    p["ln_emb_g"] = jnp.ones((H,), jnp.float32)
    p["ln_emb_b"] = jnp.zeros((H,), jnp.float32)
    p["w_qkv"] = nrm(ks[2], (H, 3 * H))
    p["b_qkv"] = jnp.zeros((3 * H,), jnp.float32)
    p["w_o"] = nrm(ks[3], (H, H))
    p["b_o"] = jnp.zeros((H,), jnp.float32)
    p["ln1_g"] = jnp.ones((H,), jnp.float32)
    p["ln1_b"] = jnp.zeros((H,), jnp.float32)
    p["w_ffn1"] = nrm(ks[4], (H, FFN))
    p["b_ffn1"] = jnp.zeros((FFN,), jnp.float32)
    p["w_ffn2"] = nrm(ks[5], (FFN, H))
    p["b_ffn2"] = jnp.zeros((H,), jnp.float32)
    p["ln2_g"] = jnp.ones((H,), jnp.float32)
    p["ln2_b"] = jnp.zeros((H,), jnp.float32)
    p["w_pool"] = nrm(ks[6], (H, H))
    p["b_pool"] = jnp.zeros((H,), jnp.float32)
    # POSEmbeddings / CharEmbeddings / SentTagEmbeddings (padding_idx=0 -> zero row)
    p["pos_tag_emb"] = nrm(ks[7], (POS_VOCAB, POS_DIM)).at[0].set(0.0)
    p["char_emb"] = nrm(ks[8], (CHAR_VOCAB, CHAR_EMBED_DIM)).at[0].set(0.0)
    p["conv_w"] = nrm(ks[9], (CONV_FILTER_SIZE, CHAR_EMBED_DIM, CHAR_FEATURE_DIM))
    p["conv_b"] = jnp.zeros((CHAR_FEATURE_DIM,), jnp.float32)
    p["bound_emb"] = nrm(ks[10], (BOUND_VOCAB, BOUND_DIM)).at[0].set(0.0)
    return p


def pack_params(p):
    """One-time packing of the many tiny parameters into a few DMA-friendly slabs."""
    f32 = jnp.float32

    # [Wqkv | Wo | Wffn1 | Wpool] share the H-row contraction dim -> one (H, 224) slab.
    w_stack = jnp.concatenate([p["w_qkv"], p["w_o"], p["w_ffn1"], p["w_pool"]], axis=1)

    def ident_at(rows, col_off):
        m = jnp.zeros((rows, OUT_PAD), f32)
        return m.at[:, col_off:col_off + rows].set(jnp.eye(rows, dtype=f32))

    # output channel layout: [bert | pos | char | bound]
    p_word = ident_at(H, 0)
    pos_off = H
    char_off = pos_off + (POS_DIM if use_pos_tags else 0)
    bnd_off = char_off + (CHAR_FEATURE_DIM if use_char_feature else 0)
    feat_blocks = []
    if use_pos_tags:
        feat_blocks.append(ident_at(POS_DIM, pos_off))
    if use_sent_boundary_tag:
        feat_blocks.append(ident_at(BOUND_DIM, bnd_off))
    p_feats = (jnp.concatenate(feat_blocks, axis=0) if feat_blocks
               else jnp.zeros((1, OUT_PAD), f32))
    p_char = ident_at(CHAR_FEATURE_DIM, char_off)

    # row-selection matrices (word rows drop CLS; CLS rows feed the pooler)
    rows = jnp.arange(B * W)
    src = (rows // W) * S + (rows % W) + 1
    sel_w = jnp.zeros((B * W, B * S), f32).at[rows, src].set(1.0)
    sel_cls = jnp.zeros((B, B * S), f32).at[jnp.arange(B), jnp.arange(B) * S].set(1.0)

    conv_w_flat = p["conv_w"].reshape(3 * CHAR_EMBED_DIM, CHAR_FEATURE_DIM)

    vec_rows = [p["ln_emb_g"], p["ln_emb_b"], p["ln1_g"], p["ln1_b"],
                p["ln2_g"], p["ln2_b"], p["b_qkv"], p["b_o"],
                p["b_ffn1"], p["b_ffn2"], p["b_pool"], p["conv_b"]]

    def row_block(a, n_rows):
        a = jnp.asarray(a, f32)
        if a.ndim == 1:
            a = a[None, :]
        return jnp.pad(a, ((0, n_rows - a.shape[0]), (0, OUT_PAD - a.shape[1])))

    const_pack = jnp.concatenate(
        [row_block(p_word, H),
         row_block(p_feats, ROW_P_CHAR - ROW_P_FEATS),
         row_block(p_char, CHAR_FEATURE_DIM),
         row_block(conv_w_flat, 3 * CHAR_EMBED_DIM),
         row_block(sel_w, ROW_SEL_CLS - ROW_SEL_W),
         row_block(sel_cls, ROW_VEC - ROW_SEL_CLS),
         jnp.concatenate([row_block(v, 1) for v in vec_rows], axis=0),
         jnp.zeros((CONST_ROWS - ROW_VEC - N_VEC, OUT_PAD), f32)],
        axis=0)
    assert const_pack.shape == (CONST_ROWS, OUT_PAD)

    return {"w_stack": w_stack, "w_ffn2": p["w_ffn2"], "const_pack": const_pack,
            "word_emb": p["word_emb"], "pos_emb_bert": p["pos_emb_bert"],
            "pos_tag_emb": p["pos_tag_emb"], "char_emb": p["char_emb"],
            "bound_emb": p["bound_emb"]}


# ============================ forward pass ============================

def encoder_forward(packed, word_ids, bert_mask, src_pos_tags, chars, bound_tags):
    f32 = jnp.float32
    # Embedding lookups stay in XLA (tiny data-dependent gathers); padding_idx=0
    # rows are zero.  Dropout layers are identity (inference semantics).
    tok = jnp.take(packed["word_emb"], word_ids, axis=0)               # (B, S, H)
    x0 = (tok + packed["pos_emb_bert"][None, :, :]).reshape(B * S, H)
    mask_bias = ((1.0 - bert_mask.astype(f32)) * (-1e9)).reshape(B, 1, S)

    feat_parts = []
    if use_pos_tags:
        feat_parts.append(jnp.take(packed["pos_tag_emb"], src_pos_tags, axis=0))
    if use_sent_boundary_tag:
        feat_parts.append(jnp.take(packed["bound_emb"], bound_tags, axis=0))
    feats = (jnp.concatenate(feat_parts, axis=-1).reshape(B * W, FEAT_DIM)
             if feat_parts else jnp.zeros((B * W, 1), f32))

    # char stream im2col (NLC) so the kernel does ONE conv matmul for all batches.
    char_e = jnp.take(packed["char_emb"], chars, axis=0)               # (B, L, E)
    char_im2col = jnp.concatenate(
        [char_e[:, j:j + LC, :] for j in range(CONV_FILTER_SIZE)], axis=-1
    ).reshape(B * LC, CONV_FILTER_SIZE * CHAR_EMBED_DIM)               # (B*LC, 3E)

    slab = pl.pallas_call(
        _fused_encoder_kernel,
        out_shape=jax.ShapeDtypeStruct((B * W + B, OUT_PAD), f32),
    )(x0, mask_bias, feats, char_im2col,
      packed["w_stack"], packed["w_ffn2"], packed["const_pack"])

    bert_embeds = slab[:B * W, :OUT_DIM].reshape(B, W, OUT_DIM)        # strip lane pad
    pooled = slab[B * W:, :H]                                          # pooler rows
    return bert_embeds, pooled


# ============================ main ============================

if __name__ == "__main__":
    key = jax.random.PRNGKey(0)
    pkey, k1, k2, k3, k4 = jax.random.split(key, 5)
    params = init_params(pkey)
    packed = pack_params(params)

    word_ids = jax.random.randint(k1, (B, S), 1, VOCAB, dtype=jnp.int32)
    bert_mask = jnp.ones((B, S), jnp.int32).at[1, S - 1].set(0)
    src_pos_tags = jax.random.randint(k2, (B, W), 1, POS_VOCAB, dtype=jnp.int32)
    chars = jax.random.randint(k3, (B, CHAR_LEN), 1, CHAR_VOCAB, dtype=jnp.int32)
    bound_tags = jax.random.randint(k4, (B, W), 1, BOUND_VOCAB, dtype=jnp.int32)

    fwd = jax.jit(functools.partial(encoder_forward, packed))
    bert_embeds, cls = fwd(word_ids, bert_mask, src_pos_tags, chars, bound_tags)
    jax.block_until_ready((bert_embeds, cls))

    assert bert_embeds.shape == (B, W, OUT_DIM)
    assert cls.shape == (B, H)
    print("KERNEL_OK")
</pallas_src>

<mosaic_0001>
module attributes {stable_mosaic.version = 11 : i64} {
  func.func @_fused_encoder_kernel(%arg0: memref<16x32xf32, #tpu.memory_space<vmem>>, %arg1: memref<2x1x8xf32, #tpu.memory_space<vmem>>, %arg2: memref<14x12xf32, #tpu.memory_space<vmem>>, %arg3: memref<112x24xf32, #tpu.memory_space<vmem>>, %arg4: memref<32x224xf32, #tpu.memory_space<vmem>>, %arg5: memref<64x32xf32, #tpu.memory_space<vmem>>, %arg6: memref<120x128xf32, #tpu.memory_space<vmem>>, %arg7: memref<16x128xf32, #tpu.memory_space<vmem>>) attributes {dimension_semantics = [], scalar_prefetch = 0 : i64, scratch_operands = 0 : i64, tpu.core_type = #tpu.core_type<tc>} {
    %c0 = arith.constant 0 : index
    %c0_0 = arith.constant 0 : index
    %0 = vector.load %arg0[%c0, %c0_0] : memref<16x32xf32, #tpu.memory_space<vmem>>, vector<16x32xf32>
    %c104 = arith.constant 104 : index
    %c0_1 = arith.constant 0 : index
    %1 = vector.load %arg6[%c104, %c0_1] : memref<120x128xf32, #tpu.memory_space<vmem>>, vector<1x32xf32>
    %c105 = arith.constant 105 : index
    %c0_2 = arith.constant 0 : index
    %2 = vector.load %arg6[%c105, %c0_2] : memref<120x128xf32, #tpu.memory_space<vmem>>, vector<1x32xf32>
    %cst = arith.constant dense<0.000000e+00> : vector<16xf32>
    %3 = vector.multi_reduction <add>, %0, %cst [1] : vector<16x32xf32> to vector<16xf32>
    %4 = vector.shape_cast %3 : vector<16xf32> to vector<16x1xf32>
    %cst_3 = arith.constant 3.200000e+01 : f32
    %5 = vector.broadcast %cst_3 : f32 to vector<16x1xf32>
    %6 = arith.divf %4, %5 : vector<16x1xf32>
    %7 = vector.broadcast %6 : vector<16x1xf32> to vector<16x32xf32>
    %8 = arith.subf %0, %7 : vector<16x32xf32>
    %9 = arith.mulf %8, %8 : vector<16x32xf32>
    %cst_4 = arith.constant dense<0.000000e+00> : vector<16xf32>
    %10 = vector.multi_reduction <add>, %9, %cst_4 [1] : vector<16x32xf32> to vector<16xf32>
    %11 = vector.shape_cast %10 : vector<16xf32> to vector<16x1xf32>
    %cst_5 = arith.constant 3.200000e+01 : f32
    %12 = vector.broadcast %cst_5 : f32 to vector<16x1xf32>
    %13 = arith.divf %11, %12 : vector<16x1xf32>
    %14 = vector.broadcast %6 : vector<16x1xf32> to vector<16x32xf32>
    %15 = arith.subf %0, %14 : vector<16x32xf32>
    %cst_6 = arith.constant 9.99999996E-13 : f32
    %16 = vector.broadcast %cst_6 : f32 to vector<16x1xf32>
    %17 = arith.addf %13, %16 : vector<16x1xf32>
    %18 = math.rsqrt %17 : vector<16x1xf32>
    %19 = vector.broadcast %18 : vector<16x1xf32> to vector<16x32xf32>
    %20 = arith.mulf %15, %19 : vector<16x32xf32>
    %21 = vector.broadcast %1 : vector<1x32xf32> to vector<16x32xf32>
    %22 = arith.mulf %20, %21 : vector<16x32xf32>
    %23 = vector.broadcast %2 : vector<1x32xf32> to vector<16x32xf32>
    %24 = arith.addf %22, %23 : vector<16x32xf32>
    %c0_7 = arith.constant 0 : index
    %c0_8 = arith.constant 0 : index
    %25 = vector.load %arg4[%c0_7, %c0_8] : memref<32x224xf32, #tpu.memory_space<vmem>>, vector<32x96xf32>
    %cst_9 = arith.constant dense<0.000000e+00> : vector<16x96xf32>
    %26 = tpu.matmul %24, %25, %cst_9 {dimension_numbers = #tpu.dot_dimension_numbers<[1], [0], [0], [1], [0, 0, 1, 1], [], []>} : vector<16x32xf32>, vector<32x96xf32>, vector<16x96xf32> -> vector<16x96xf32>
    %c110 = arith.constant 110 : index
    %c0_10 = arith.constant 0 : index
    %27 = vector.load %arg6[%c110, %c0_10] : memref<120x128xf32, #tpu.memory_space<vmem>>, vector<1x96xf32>
    %28 = vector.broadcast %27 : vector<1x96xf32> to vector<16x96xf32>
    %29 = arith.addf %26, %28 : vector<16x96xf32>
    %c0_11 = arith.constant 0 : index
    %c0_12 = arith.constant 0 : index
    %c0_13 = arith.constant 0 : index
    %30 = vector.load %arg1[%c0_11, %c0_12, %c0_13] : memref<2x1x8xf32, #tpu.memory_space<vmem>>, vector<2x1x8xf32>
    %31 = vector.extract_strided_slice %29 {offsets = [0, 0], sizes = [16, 8], strides = [1, 1]} : vector<16x96xf32> to vector<16x8xf32>
    %32 = vector.shape_cast %31 : vector<16x8xf32> to vector<2x8x8xf32>
    %33 = vector.extract_strided_slice %29 {offsets = [0, 32], sizes = [16, 8], strides = [1, 1]} : vector<16x96xf32> to vector<16x8xf32>
    %34 = vector.shape_cast %33 : vector<16x8xf32> to vector<2x8x8xf32>
    %35 = vector.extract_strided_slice %29 {offsets = [0, 64], sizes = [16, 8], strides = [1, 1]} : vector<16x96xf32> to vector<16x8xf32>
    %36 = vector.shape_cast %35 : vector<16x8xf32> to vector<2x8x8xf32>
    "tpu.trace_start"() <{level = 10 : i32, message = "bqd,bkd->bqk"}> : () -> ()
    %cst_14 = arith.constant dense<0.000000e+00> : vector<2x8x8xf32>
    %37 = tpu.matmul %32, %34, %cst_14 {dimension_numbers = #tpu.dot_dimension_numbers<[2], [2], [1], [1], [0, 0, 0, 1, 1, 1], [0], [0]>} : vector<2x8x8xf32>, vector<2x8x8xf32>, vector<2x8x8xf32> -> vector<2x8x8xf32>
    "tpu.trace_stop"() : () -> ()
    %cst_15 = arith.constant 0.353553385 : f32
    %38 = vector.broadcast %cst_15 : f32 to vector<2x8x8xf32>
    %39 = arith.mulf %37, %38 : vector<2x8x8xf32>
    %40 = vector.broadcast %30 : vector<2x1x8xf32> to vector<2x8x8xf32>
    %41 = arith.addf %39, %40 : vector<2x8x8xf32>
    %cst_16 = arith.constant dense<0xFF800000> : vector<2x8xf32>
    %42 = vector.multi_reduction <maximumf>, %41, %cst_16 [2] : vector<2x8x8xf32> to vector<2x8xf32>
    %43 = vector.shape_cast %42 : vector<2x8xf32> to vector<2x8x1xf32>
    %44 = vector.broadcast %43 : vector<2x8x1xf32> to vector<2x8x8xf32>
    %45 = arith.subf %41, %44 : vector<2x8x8xf32>
    %46 = math.exp %45 : vector<2x8x8xf32>
    %cst_17 = arith.constant dense<0.000000e+00> : vector<2x8xf32>
    %47 = vector.multi_reduction <add>, %46, %cst_17 [2] : vector<2x8x8xf32> to vector<2x8xf32>
    %48 = vector.shape_cast %47 : vector<2x8xf32> to vector<2x8x1xf32>
    %49 = vector.broadcast %48 : vector<2x8x1xf32> to vector<2x8x8xf32>
    %50 = arith.divf %46, %49 : vector<2x8x8xf32>
    "tpu.trace_start"() <{level = 10 : i32, message = "bqk,bkd->bqd"}> : () -> ()
    %cst_18 = arith.constant dense<0.000000e+00> : vector<2x8x8xf32>
    %51 = tpu.matmul %50, %36, %cst_18 {dimension_numbers = #tpu.dot_dimension_numbers<[2], [1], [1], [2], [0, 0, 0, 1, 1, 2], [0], [0]>} : vector<2x8x8xf32>, vector<2x8x8xf32>, vector<2x8x8xf32> -> vector<2x8x8xf32>
    "tpu.trace_stop"() : () -> ()
    %52 = vector.shape_cast %51 : vector<2x8x8xf32> to vector<16x8xf32>
    %53 = vector.extract_strided_slice %29 {offsets = [0, 8], sizes = [16, 8], strides = [1, 1]} : vector<16x96xf32> to vector<16x8xf32>
    %54 = vector.shape_cast %53 : vector<16x8xf32> to vector<2x8x8xf32>
    %55 = vector.extract_strided_slice %29 {offsets = [0, 40], sizes = [16, 8], strides = [1, 1]} : vector<16x96xf32> to vector<16x8xf32>
    %56 = vector.shape_cast %55 : vector<16x8xf32> to vector<2x8x8xf32>
    %57 = vector.extract_strided_slice %29 {offsets = [0, 72], sizes = [16, 8], strides = [1, 1]} : vector<16x96xf32> to vector<16x8xf32>
    %58 = vector.shape_cast %57 : vector<16x8xf32> to vector<2x8x8xf32>
    "tpu.trace_start"() <{level = 10 : i32, message = "bqd,bkd->bqk"}> : () -> ()
    %cst_19 = arith.constant dense<0.000000e+00> : vector<2x8x8xf32>
    %59 = tpu.matmul %54, %56, %cst_19 {dimension_numbers = #tpu.dot_dimension_numbers<[2], [2], [1], [1], [0, 0, 0, 1, 1, 1], [0], [0]>} : vector<2x8x8xf32>, vector<2x8x8xf32>, vector<2x8x8xf32> -> vector<2x8x8xf32>
    "tpu.trace_stop"() : () -> ()
    %cst_20 = arith.constant 0.353553385 : f32
    %60 = vector.broadcast %cst_20 : f32 to vector<2x8x8xf32>
    %61 = arith.mulf %59, %60 : vector<2x8x8xf32>
    %62 = vector.broadcast %30 : vector<2x1x8xf32> to vector<2x8x8xf32>
    %63 = arith.addf %61, %62 : vector<2x8x8xf32>
    %cst_21 = arith.constant dense<0xFF800000> : vector<2x8xf32>
    %64 = vector.multi_reduction <maximumf>, %63, %cst_21 [2] : vector<2x8x8xf32> to vector<2x8xf32>
    %65 = vector.shape_cast %64 : vector<2x8xf32> to vector<2x8x1xf32>
    %66 = vector.broadcast %65 : vector<2x8x1xf32> to vector<2x8x8xf32>
    %67 = arith.subf %63, %66 : vector<2x8x8xf32>
    %68 = math.exp %67 : vector<2x8x8xf32>
    %cst_22 = arith.constant dense<0.000000e+00> : vector<2x8xf32>
    %69 = vector.multi_reduction <add>, %68, %cst_22 [2] : vector<2x8x8xf32> to vector<2x8xf32>
    %70 = vector.shape_cast %69 : vector<2x8xf32> to vector<2x8x1xf32>
    %71 = vector.broadcast %70 : vector<2x8x1xf32> to vector<2x8x8xf32>
    %72 = arith.divf %68, %71 : vector<2x8x8xf32>
    "tpu.trace_start"() <{level = 10 : i32, message = "bqk,bkd->bqd"}> : () -> ()
    %cst_23 = arith.constant dense<0.000000e+00> : vector<2x8x8xf32>
    %73 = tpu.matmul %72, %58, %cst_23 {dimension_numbers = #tpu.dot_dimension_numbers<[2], [1], [1], [2], [0, 0, 0, 1, 1, 2], [0], [0]>} : vector<2x8x8xf32>, vector<2x8x8xf32>, vector<2x8x8xf32> -> vector<2x8x8xf32>
    "tpu.trace_stop"() : () -> ()
    %74 = vector.shape_cast %73 : vector<2x8x8xf32> to vector<16x8xf32>
    %75 = vector.extract_strided_slice %29 {offsets = [0, 16], sizes = [16, 8], strides = [1, 1]} : vector<16x96xf32> to vector<16x8xf32>
    %76 = vector.shape_cast %75 : vector<16x8xf32> to vector<2x8x8xf32>
    %77 = vector.extract_strided_slice %29 {offsets = [0, 48], sizes = [16, 8], strides = [1, 1]} : vector<16x96xf32> to vector<16x8xf32>
    %78 = vector.shape_cast %77 : vector<16x8xf32> to vector<2x8x8xf32>
    %79 = vector.extract_strided_slice %29 {offsets = [0, 80], sizes = [16, 8], strides = [1, 1]} : vector<16x96xf32> to vector<16x8xf32>
    %80 = vector.shape_cast %79 : vector<16x8xf32> to vector<2x8x8xf32>
    "tpu.trace_start"() <{level = 10 : i32, message = "bqd,bkd->bqk"}> : () -> ()
    %cst_24 = arith.constant dense<0.000000e+00> : vector<2x8x8xf32>
    %81 = tpu.matmul %76, %78, %cst_24 {dimension_numbers = #tpu.dot_dimension_numbers<[2], [2], [1], [1], [0, 0, 0, 1, 1, 1], [0], [0]>} : vector<2x8x8xf32>, vector<2x8x8xf32>, vector<2x8x8xf32> -> vector<2x8x8xf32>
    "tpu.trace_stop"() : () -> ()
    %cst_25 = arith.constant 0.353553385 : f32
    %82 = vector.broadcast %cst_25 : f32 to vector<2x8x8xf32>
    %83 = arith.mulf %81, %82 : vector<2x8x8xf32>
    %84 = vector.broadcast %30 : vector<2x1x8xf32> to vector<2x8x8xf32>
    %85 = arith.addf %83, %84 : vector<2x8x8xf32>
    %cst_26 = arith.constant dense<0xFF800000> : vector<2x8xf32>
    %86 = vector.multi_reduction <maximumf>, %85, %cst_26 [2] : vector<2x8x8xf32> to vector<2x8xf32>
    %87 = vector.shape_cast %86 : vector<2x8xf32> to vector<2x8x1xf32>
    %88 = vector.broadcast %87 : vector<2x8x1xf32> to vector<2x8x8xf32>
    %89 = arith.subf %85, %88 : vector<2x8x8xf32>
    %90 = math.exp %89 : vector<2x8x8xf32>
    %cst_27 = arith.constant dense<0.000000e+00> : vector<2x8xf32>
    %91 = vector.multi_reduction <add>, %90, %cst_27 [2] : vector<2x8x8xf32> to vector<2x8xf32>
    %92 = vector.shape_cast %91 : vector<2x8xf32> to vector<2x8x1xf32>
    %93 = vector.broadcast %92 : vector<2x8x1xf32> to vector<2x8x8xf32>
    %94 = arith.divf %90, %93 : vector<2x8x8xf32>
    "tpu.trace_start"() <{level = 10 : i32, message = "bqk,bkd->bqd"}> : () -> ()
    %cst_28 = arith.constant dense<0.000000e+00> : vector<2x8x8xf32>
    %95 = tpu.matmul %94, %80, %cst_28 {dimension_numbers = #tpu.dot_dimension_numbers<[2], [1], [1], [2], [0, 0, 0, 1, 1, 2], [0], [0]>} : vector<2x8x8xf32>, vector<2x8x8xf32>, vector<2x8x8xf32> -> vector<2x8x8xf32>
    "tpu.trace_stop"() : () -> ()
    %96 = vector.shape_cast %95 : vector<2x8x8xf32> to vector<16x8xf32>
    %97 = vector.extract_strided_slice %29 {offsets = [0, 24], sizes = [16, 8], strides = [1, 1]} : vector<16x96xf32> to vector<16x8xf32>
    %98 = vector.shape_cast %97 : vector<16x8xf32> to vector<2x8x8xf32>
    %99 = vector.extract_strided_slice %29 {offsets = [0, 56], sizes = [16, 8], strides = [1, 1]} : vector<16x96xf32> to vector<16x8xf32>
    %100 = vector.shape_cast %99 : vector<16x8xf32> to vector<2x8x8xf32>
    %101 = vector.extract_strided_slice %29 {offsets = [0, 88], sizes = [16, 8], strides = [1, 1]} : vector<16x96xf32> to vector<16x8xf32>
    %102 = vector.shape_cast %101 : vector<16x8xf32> to vector<2x8x8xf32>
    "tpu.trace_start"() <{level = 10 : i32, message = "bqd,bkd->bqk"}> : () -> ()
    %cst_29 = arith.constant dense<0.000000e+00> : vector<2x8x8xf32>
    %103 = tpu.matmul %98, %100, %cst_29 {dimension_numbers = #tpu.dot_dimension_numbers<[2], [2], [1], [1], [0, 0, 0, 1, 1, 1], [0], [0]>} : vector<2x8x8xf32>, vector<2x8x8xf32>, vector<2x8x8xf32> -> vector<2x8x8xf32>
    "tpu.trace_stop"() : () -> ()
    %cst_30 = arith.constant 0.353553385 : f32
    %104 = vector.broadcast %cst_30 : f32 to vector<2x8x8xf32>
    %105 = arith.mulf %103, %104 : vector<2x8x8xf32>
    %106 = vector.broadcast %30 : vector<2x1x8xf32> to vector<2x8x8xf32>
    %107 = arith.addf %105, %106 : vector<2x8x8xf32>
    %cst_31 = arith.constant dense<0xFF800000> : vector<2x8xf32>
    %108 = vector.multi_reduction <maximumf>, %107, %cst_31 [2] : vector<2x8x8xf32> to vector<2x8xf32>
    %109 = vector.shape_cast %108 : vector<2x8xf32> to vector<2x8x1xf32>
    %110 = vector.broadcast %109 : vector<2x8x1xf32> to vector<2x8x8xf32>
    %111 = arith.subf %107, %110 : vector<2x8x8xf32>
    %112 = math.exp %111 : vector<2x8x8xf32>
    %cst_32 = arith.constant dense<0.000000e+00> : vector<2x8xf32>
    %113 = vector.multi_reduction <add>, %112, %cst_32 [2] : vector<2x8x8xf32> to vector<2x8xf32>
    %114 = vector.shape_cast %113 : vector<2x8xf32> to vector<2x8x1xf32>
    %115 = vector.broadcast %114 : vector<2x8x1xf32> to vector<2x8x8xf32>
    %116 = arith.divf %112, %115 : vector<2x8x8xf32>
    "tpu.trace_start"() <{level = 10 : i32, message = "bqk,bkd->bqd"}> : () -> ()
    %cst_33 = arith.constant dense<0.000000e+00> : vector<2x8x8xf32>
    %117 = tpu.matmul %116, %102, %cst_33 {dimension_numbers = #tpu.dot_dimension_numbers<[2], [1], [1], [2], [0, 0, 0, 1, 1, 2], [0], [0]>} : vector<2x8x8xf32>, vector<2x8x8xf32>, vector<2x8x8xf32> -> vector<2x8x8xf32>
    "tpu.trace_stop"() : () -> ()
    %118 = vector.shape_cast %117 : vector<2x8x8xf32> to vector<16x8xf32>
    %119 = tpu.concatenate %52, %74, %96, %118 in 1 : vector<16x8xf32>, vector<16x8xf32>, vector<16x8xf32>, vector<16x8xf32> -> vector<16x32xf32>
    %c0_34 = arith.constant 0 : index
    %c96 = arith.constant 96 : index
    %120 = vector.load %arg4[%c0_34, %c96] : memref<32x224xf32, #tpu.memory_space<vmem>>, vector<32x32xf32>
    %cst_35 = arith.constant dense<0.000000e+00> : vector<16x32xf32>
    %121 = tpu.matmul %119, %120, %cst_35 {dimension_numbers = #tpu.dot_dimension_numbers<[1], [0], [0], [1], [0, 0, 1, 1], [], []>} : vector<16x32xf32>, vector<32x32xf32>, vector<16x32xf32> -> vector<16x32xf32>
    %c111 = arith.constant 111 : index
    %c0_36 = arith.constant 0 : index
    %122 = vector.load %arg6[%c111, %c0_36] : memref<120x128xf32, #tpu.memory_space<vmem>>, vector<1x32xf32>
    %123 = vector.broadcast %122 : vector<1x32xf32> to vector<16x32xf32>
    %124 = arith.addf %121, %123 : vector<16x32xf32>
    %125 = arith.addf %24, %124 : vector<16x32xf32>
    %c106 = arith.constant 106 : index
    %c0_37 = arith.constant 0 : index
    %126 = vector.load %arg6[%c106, %c0_37] : memref<120x128xf32, #tpu.memory_space<vmem>>, vector<1x32xf32>
    %c107 = arith.constant 107 : index
    %c0_38 = arith.constant 0 : index
    %127 = vector.load %arg6[%c107, %c0_38] : memref<120x128xf32, #tpu.memory_space<vmem>>, vector<1x32xf32>
    %cst_39 = arith.constant dense<0.000000e+00> : vector<16xf32>
    %128 = vector.multi_reduction <add>, %125, %cst_39 [1] : vector<16x32xf32> to vector<16xf32>
    %129 = vector.shape_cast %128 : vector<16xf32> to vector<16x1xf32>
    %cst_40 = arith.constant 3.200000e+01 : f32
    %130 = vector.broadcast %cst_40 : f32 to vector<16x1xf32>
    %131 = arith.divf %129, %130 : vector<16x1xf32>
    %132 = vector.broadcast %131 : vector<16x1xf32> to vector<16x32xf32>
    %133 = arith.subf %125, %132 : vector<16x32xf32>
    %134 = arith.mulf %133, %133 : vector<16x32xf32>
    %cst_41 = arith.constant dense<0.000000e+00> : vector<16xf32>
    %135 = vector.multi_reduction <add>, %134, %cst_41 [1] : vector<16x32xf32> to vector<16xf32>
    %136 = vector.shape_cast %135 : vector<16xf32> to vector<16x1xf32>
    %cst_42 = arith.constant 3.200000e+01 : f32
    %137 = vector.broadcast %cst_42 : f32 to vector<16x1xf32>
    %138 = arith.divf %136, %137 : vector<16x1xf32>
    %139 = vector.broadcast %131 : vector<16x1xf32> to vector<16x32xf32>
    %140 = arith.subf %125, %139 : vector<16x32xf32>
    %cst_43 = arith.constant 9.99999996E-13 : f32
    %141 = vector.broadcast %cst_43 : f32 to vector<16x1xf32>
    %142 = arith.addf %138, %141 : vector<16x1xf32>
    %143 = math.rsqrt %142 : vector<16x1xf32>
    %144 = vector.broadcast %143 : vector<16x1xf32> to vector<16x32xf32>
    %145 = arith.mulf %140, %144 : vector<16x32xf32>
    %146 = vector.broadcast %126 : vector<1x32xf32> to vector<16x32xf32>
    %147 = arith.mulf %145, %146 : vector<16x32xf32>
    %148 = vector.broadcast %127 : vector<1x32xf32> to vector<16x32xf32>
    %149 = arith.addf %147, %148 : vector<16x32xf32>
    %c0_44 = arith.constant 0 : index
    %c128 = arith.constant 128 : index
    %150 = vector.load %arg4[%c0_44, %c128] : memref<32x224xf32, #tpu.memory_space<vmem>>, vector<32x64xf32>
    %cst_45 = arith.constant dense<0.000000e+00> : vector<16x64xf32>
    %151 = tpu.matmul %149, %150, %cst_45 {dimension_numbers = #tpu.dot_dimension_numbers<[1], [0], [0], [1], [0, 0, 1, 1], [], []>} : vector<16x32xf32>, vector<32x64xf32>, vector<16x64xf32> -> vector<16x64xf32>
    %c112 = arith.constant 112 : index
    %c0_46 = arith.constant 0 : index
    %152 = vector.load %arg6[%c112, %c0_46] : memref<120x128xf32, #tpu.memory_space<vmem>>, vector<1x64xf32>
    %153 = vector.broadcast %152 : vector<1x64xf32> to vector<16x64xf32>
    %154 = arith.addf %151, %153 : vector<16x64xf32>
    %155 = arith.mulf %154, %154 : vector<16x64xf32>
    %156 = arith.mulf %154, %155 : vector<16x64xf32>
    %cst_47 = arith.constant 4.471500e-02 : f32
    %157 = vector.broadcast %cst_47 : f32 to vector<16x64xf32>
    %158 = arith.mulf %157, %156 : vector<16x64xf32>
    %159 = arith.addf %154, %158 : vector<16x64xf32>
    %cst_48 = arith.constant 0.797884583 : f32
    %160 = vector.broadcast %cst_48 : f32 to vector<16x64xf32>
    %161 = arith.mulf %160, %159 : vector<16x64xf32>
    %162 = math.tanh %161 : vector<16x64xf32>
    %cst_49 = arith.constant 1.000000e+00 : f32
    %163 = vector.broadcast %cst_49 : f32 to vector<16x64xf32>
    %164 = arith.addf %163, %162 : vector<16x64xf32>
    %cst_50 = arith.constant 5.000000e-01 : f32
    %165 = vector.broadcast %cst_50 : f32 to vector<16x64xf32>
    %166 = arith.mulf %165, %164 : vector<16x64xf32>
    %167 = arith.mulf %154, %166 : vector<16x64xf32>
    %c0_51 = arith.constant 0 : index
    %c0_52 = arith.constant 0 : index
    %168 = vector.load %arg5[%c0_51, %c0_52] : memref<64x32xf32, #tpu.memory_space<vmem>>, vector<64x32xf32>
    %cst_53 = arith.constant dense<0.000000e+00> : vector<16x32xf32>
    %169 = tpu.matmul %167, %168, %cst_53 {dimension_numbers = #tpu.dot_dimension_numbers<[1], [0], [0], [1], [0, 0, 1, 1], [], []>} : vector<16x64xf32>, vector<64x32xf32>, vector<16x32xf32> -> vector<16x32xf32>
    %c113 = arith.constant 113 : index
    %c0_54 = arith.constant 0 : index
    %170 = vector.load %arg6[%c113, %c0_54] : memref<120x128xf32, #tpu.memory_space<vmem>>, vector<1x32xf32>
    %171 = vector.broadcast %170 : vector<1x32xf32> to vector<16x32xf32>
    %172 = arith.addf %169, %171 : vector<16x32xf32>
    %173 = arith.addf %149, %172 : vector<16x32xf32>
    %c108 = arith.constant 108 : index
    %c0_55 = arith.constant 0 : index
    %174 = vector.load %arg6[%c108, %c0_55] : memref<120x128xf32, #tpu.memory_space<vmem>>, vector<1x32xf32>
    %c109 = arith.constant 109 : index
    %c0_56 = arith.constant 0 : index
    %175 = vector.load %arg6[%c109, %c0_56] : memref<120x128xf32, #tpu.memory_space<vmem>>, vector<1x32xf32>
    %cst_57 = arith.constant dense<0.000000e+00> : vector<16xf32>
    %176 = vector.multi_reduction <add>, %173, %cst_57 [1] : vector<16x32xf32> to vector<16xf32>
    %177 = vector.shape_cast %176 : vector<16xf32> to vector<16x1xf32>
    %cst_58 = arith.constant 3.200000e+01 : f32
    %178 = vector.broadcast %cst_58 : f32 to vector<16x1xf32>
    %179 = arith.divf %177, %178 : vector<16x1xf32>
    %180 = vector.broadcast %179 : vector<16x1xf32> to vector<16x32xf32>
    %181 = arith.subf %173, %180 : vector<16x32xf32>
    %182 = arith.mulf %181, %181 : vector<16x32xf32>
    %cst_59 = arith.constant dense<0.000000e+00> : vector<16xf32>
    %183 = vector.multi_reduction <add>, %182, %cst_59 [1] : vector<16x32xf32> to vector<16xf32>
    %184 = vector.shape_cast %183 : vector<16xf32> to vector<16x1xf32>
    %cst_60 = arith.constant 3.200000e+01 : f32
    %185 = vector.broadcast %cst_60 : f32 to vector<16x1xf32>
    %186 = arith.divf %184, %185 : vector<16x1xf32>
    %187 = vector.broadcast %179 : vector<16x1xf32> to vector<16x32xf32>
    %188 = arith.subf %173, %187 : vector<16x32xf32>
    %cst_61 = arith.constant 9.99999996E-13 : f32
    %189 = vector.broadcast %cst_61 : f32 to vector<16x1xf32>
    %190 = arith.addf %186, %189 : vector<16x1xf32>
    %191 = math.rsqrt %190 : vector<16x1xf32>
    %192 = vector.broadcast %191 : vector<16x1xf32> to vector<16x32xf32>
    %193 = arith.mulf %188, %192 : vector<16x32xf32>
    %194 = vector.broadcast %174 : vector<1x32xf32> to vector<16x32xf32>
    %195 = arith.mulf %193, %194 : vector<16x32xf32>
    %196 = vector.broadcast %175 : vector<1x32xf32> to vector<16x32xf32>
    %197 = arith.addf %195, %196 : vector<16x32xf32>
    %c0_62 = arith.constant 0 : index
    %c0_63 = arith.constant 0 : index
    %198 = vector.load %arg6[%c0_62, %c0_63] : memref<120x128xf32, #tpu.memory_space<vmem>>, vector<32x128xf32>
    %c0_64 = arith.constant 0 : index
    %c192 = arith.constant 192 : index
    %199 = vector.load %arg4[%c0_64, %c192] : memref<32x224xf32, #tpu.memory_space<vmem>>, vector<32x32xf32>
    %cst_65 = arith.constant dense<0.000000e+00> : vector<16x32xf32>
    %200 = tpu.matmul %197, %199, %cst_65 {dimension_numbers = #tpu.dot_dimension_numbers<[1], [0], [0], [1], [0, 0, 1, 1], [], []>} : vector<16x32xf32>, vector<32x32xf32>, vector<16x32xf32> -> vector<16x32xf32>
    %c114 = arith.constant 114 : index
    %c0_66 = arith.constant 0 : index
    %201 = vector.load %arg6[%c114, %c0_66] : memref<120x128xf32, #tpu.memory_space<vmem>>, vector<1x32xf32>
    %202 = vector.broadcast %201 : vector<1x32xf32> to vector<16x32xf32>
    %203 = arith.addf %200, %202 : vector<16x32xf32>
    %204 = math.tanh %203 : vector<16x32xf32>
    %c96_67 = arith.constant 96 : index
    %c0_68 = arith.constant 0 : index
    %205 = vector.load %arg6[%c96_67, %c0_68] : memref<120x128xf32, #tpu.memory_space<vmem>>, vector<2x16xf32>
    %cst_69 = arith.constant dense<0.000000e+00> : vector<2x32xf32>
    %206 = tpu.matmul %205, %204, %cst_69 {dimension_numbers = #tpu.dot_dimension_numbers<[1], [0], [0], [1], [0, 0, 1, 1], [], []>} : vector<2x16xf32>, vector<16x32xf32>, vector<2x32xf32> -> vector<2x32xf32>
    %cst_70 = arith.constant dense<0.000000e+00> : vector<2x128xf32>
    %207 = tpu.matmul %206, %198, %cst_70 {dimension_numbers = #tpu.dot_dimension_numbers<[1], [0], [0], [1], [0, 0, 1, 1], [], []>} : vector<2x32xf32>, vector<32x128xf32>, vector<2x128xf32> -> vector<2x128xf32>
    %c80 = arith.constant 80 : index
    %c0_71 = arith.constant 0 : index
    %208 = vector.load %arg6[%c80, %c0_71] : memref<120x128xf32, #tpu.memory_space<vmem>>, vector<14x16xf32>
    %cst_72 = arith.constant dense<0.000000e+00> : vector<14x32xf32>
    %209 = tpu.matmul %208, %197, %cst_72 {dimension_numbers = #tpu.dot_dimension_numbers<[1], [0], [0], [1], [0, 0, 1, 1], [], []>} : vector<14x16xf32>, vector<16x32xf32>, vector<14x32xf32> -> vector<14x32xf32>
    %cst_73 = arith.constant dense<0.000000e+00> : vector<14x128xf32>
    %210 = tpu.matmul %209, %198, %cst_73 {dimension_numbers = #tpu.dot_dimension_numbers<[1], [0], [0], [1], [0, 0, 1, 1], [], []>} : vector<14x32xf32>, vector<32x128xf32>, vector<14x128xf32> -> vector<14x128xf32>
    %c0_74 = arith.constant 0 : index
    %c0_75 = arith.constant 0 : index
    %211 = vector.load %arg2[%c0_74, %c0_75] : memref<14x12xf32, #tpu.memory_space<vmem>>, vector<14x12xf32>
    %c32 = arith.constant 32 : index
    %c0_76 = arith.constant 0 : index
    %212 = vector.load %arg6[%c32, %c0_76] : memref<120x128xf32, #tpu.memory_space<vmem>>, vector<12x128xf32>
    %cst_77 = arith.constant dense<0.000000e+00> : vector<14x128xf32>
    %213 = tpu.matmul %211, %212, %cst_77 {dimension_numbers = #tpu.dot_dimension_numbers<[1], [0], [0], [1], [0, 0, 1, 1], [], []>} : vector<14x12xf32>, vector<12x128xf32>, vector<14x128xf32> -> vector<14x128xf32>
    %214 = arith.addf %210, %213 : vector<14x128xf32>
    %c0_78 = arith.constant 0 : index
    %c0_79 = arith.constant 0 : index
    %215 = vector.load %arg3[%c0_78, %c0_79] : memref<112x24xf32, #tpu.memory_space<vmem>>, vector<112x24xf32>
    %c56 = arith.constant 56 : index
    %c0_80 = arith.constant 0 : index
    %216 = vector.load %arg6[%c56, %c0_80] : memref<120x128xf32, #tpu.memory_space<vmem>>, vector<24x8xf32>
    %cst_81 = arith.constant dense<0.000000e+00> : vector<112x8xf32>
    %217 = tpu.matmul %215, %216, %cst_81 {dimension_numbers = #tpu.dot_dimension_numbers<[1], [0], [0], [1], [0, 0, 1, 1], [], []>} : vector<112x24xf32>, vector<24x8xf32>, vector<112x8xf32> -> vector<112x8xf32>
    %c115 = arith.constant 115 : index
    %c0_82 = arith.constant 0 : index
    %218 = vector.load %arg6[%c115, %c0_82] : memref<120x128xf32, #tpu.memory_space<vmem>>, vector<1x8xf32>
    %219 = vector.broadcast %218 : vector<1x8xf32> to vector<112x8xf32>
    %220 = arith.addf %217, %219 : vector<112x8xf32>
    %221 = vector.shape_cast %220 : vector<112x8xf32> to vector<14x8x8xf32>
    %cst_83 = arith.constant dense<0xFF800000> : vector<14x8xf32>
    %222 = vector.multi_reduction <maximumf>, %221, %cst_83 [1] : vector<14x8x8xf32> to vector<14x8xf32>
    %223 = math.tanh %222 : vector<14x8xf32>
    %c48 = arith.constant 48 : index
    %c0_84 = arith.constant 0 : index
    %224 = vector.load %arg6[%c48, %c0_84] : memref<120x128xf32, #tpu.memory_space<vmem>>, vector<8x128xf32>
    %cst_85 = arith.constant dense<0.000000e+00> : vector<14x128xf32>
    %225 = tpu.matmul %223, %224, %cst_85 {dimension_numbers = #tpu.dot_dimension_numbers<[1], [0], [0], [1], [0, 0, 1, 1], [], []>} : vector<14x8xf32>, vector<8x128xf32>, vector<14x128xf32> -> vector<14x128xf32>
    %226 = arith.addf %214, %225 : vector<14x128xf32>
    %227 = tpu.concatenate %226, %207 in 0 : vector<14x128xf32>, vector<2x128xf32> -> vector<16x128xf32>
    %c0_86 = arith.constant 0 : index
    %c0_87 = arith.constant 0 : index
    %228 = vector.load %arg7[%c0_86, %c0_87] : memref<16x128xf32, #tpu.memory_space<vmem>>, vector<16x128xf32>
    tpu.vector_store %arg7[%c0_86, %c0_87], %227 {strides = array<i32>} : memref<16x128xf32, #tpu.memory_space<vmem>>, vector<16x128xf32>,
    return
  }
}

</mosaic_0001>

<bundles_post_ra>
// kernel: encoder_forward.1
= control target key start
LH: loop header
LB: loop body
LE: loop exit
PB: predicated region body
PF: predicated region fallthrough
CT: control target
= control target key end

     0   :  { %vm30_vm0 = vcmask 261120   ;;  %v3481_v36 = vmov 0.0   ;;  %vm3482_vm1 = vmmov 0   ;;  %s3483_s18 = smov 96   ;;  %vm165_vm2 = vcmask 64512   ;;  %s3484_s23 = smov 64   ;;  %s4018_s0 = inlined_call_operand.vmem [shape: f32[16,32], index: 0, kind: input, shape index: {}]   ;;  %s4019_s4 = inlined_call_operand.vmem [shape: f32[32,224], index: 4, kind: input, shape index: {}]   ;;  %s4020_s6 = inlined_call_operand.vmem [shape: f32[120,128], index: 6, kind: input, shape index: {}]   ;;  %s4021_s1 = inlined_call_operand.vmem [shape: f32[2,1,8], index: 1, kind: input, shape index: {}]   ;;  %s4022_s5 = inlined_call_operand.vmem [shape: f32[64,32], index: 5, kind: input, shape index: {}]   ;;  %s4023_s3 = inlined_call_operand.vmem [shape: f32[112,24], index: 3, kind: input, shape index: {}]   ;;  %s4024_s2 = inlined_call_operand.vmem [shape: f32[14,12], index: 2, kind: input, shape index: {}]   ;;  %s4025_s7 = inlined_call_operand.vmem [shape: f32[16,128], index: 7, kind: output, shape index: {}]  }
   0x1   :  { %v26_v0 = vld [vmem:[%s4018_s0] sm:$0xff]  ;;  %v27_v1 = vld [vmem:[%s4018_s0 + $0x8] sm:$0xff]  ;;  %v3558_v15 = vld [vmem:[%s4019_s4 + $0x10] sm:$0xff]  ;;  %3072 = vmatprep.subr.mxu1 %v3481_v36  ;;  %3074 = vmatprep.mubr.msk.f32.mxu1 %vm3482_vm1, %v3481_v36  ;;  %s3485_s24 = smov 88   ;;  %s3487_s25 = smov 56   ;;  %vm1538_vm3 = vcmask 195584  }
   0x2   :  { %v31_v2 = vsel %vm30_vm0, %v26_v0, 0.0  ;;  %v34_v3 = vsel %vm30_vm0, %v27_v1, 0.0  ;;  %v3553_v14 = vld [vmem:[%s4019_s4] sm:$0xff]  ;;  %v3570_v18 = vld [vmem:[%s4019_s4 + $0x30] sm:$0xff]  ;;  %v2880_v27 = vld [vmem:[%s4020_s6 + $0x68] ss:$0 sm:$0xff] }
   0x3   :  { %32 = vadd.xlane.f32.xlu0 %v31_v2  ;;  %v3563_v16 = vld [vmem:[%s4019_s4 + $0x20] sm:$0xff]  ;;  %v3279_v17 = vpack.c.bf16 %v3558_v15, %v3553_v14  ;;  %v2881_v29 = vld [vmem:[%s4020_s6 + $0x69] ss:$0 sm:$0xff]  ;;  %v2882_v37 = vld [vmem:[%s4020_s6 + $0x6e] ss:$0 sm:$0xff]  ;;  %s3488_s26 = smov 80  }
   0x4   :  { %v3283_v19 = vpack.c.bf16 %v3570_v18, %v3563_v16  ;;  %v3618_v45 = vld [vmem:[%s4021_s1] ss:$0 sm:$0xff]  ;;  %v3624_v50 = vld [vmem:[%s4021_s1 + $0x1] ss:$0 sm:$0xff]  ;;  %s3486_s1 = smov 120   ;;  %s3489_s27 = smov 112  }
   0x5   :  { %3280 = vmatprep.subr.bf16.mxu0 %v3279_v17  ;;  %s3490_s0 = smov 48   ;;  %s3491_s28 = smov 72   ;;  %vm1535_vm4 = vcmask 130048   ;;  %vm1810_vm5 = vcmask 523264   ;;  %vm2283_vm6 = vcmask 1043456   ;;  %vm3499_vm7 = vmmov 1  }
   0x6   :  { %3282 = vmatpush3.bf16.msra.mxu0 %v3279_v17  ;;  %s3492_s29 = smov 104   ;;  %s3493_s30 = smov 40   ;;  %vm3341_vm8 = vmpackc.low %vm2283_vm6, %vm3499_vm7  ;;  %vm2276_vm9 = vcmask 97280   ;;  %vm2769_vm10 = vcmask 1041409   ;;  %vm2771_vm11 = vcmask 1042434   ;;  %vm2773_vm12 = vcmask 1043459  }
   0x7   :  { %35 = vadd.xlane.f32.xlu0 %v34_v3  ;;  %3284 = vmatprep.subr.bf16.mxu0 %v3283_v19  ;;  %s3494_s8 = smov 32   ;;  %s3495_s9 = smov 8   ;;  %vm2775_vm13 = vcmask 1044484   ;;  %vm2777_vm14 = vcmask 1045509   ;;  %vm2779_vm15 = vcmask 1046534  }
   0x8   :  { %s3496_s10 = smov 16   ;;  %s3497_s11 = smov 24  }
   0xa   :  { %3286 = vmatpush3.bf16.msra.mxu0 %v3283_v19 }
   0xb   :  { %3082 = vmatprep.subr.mxu0 %v3481_v36 }
  0x90   :  { %v33_v4 = vpop.xlane.xlu0 %32 }
  0x91   :  { %v38_v5 = vmul.f32 0.03125, %v33_v4 }
  0x93   :  { %v40_v6 = vsub.f32 %v26_v0, %v38_v5 }
  0x94   :  { %v36_v7 = vpop.xlane.xlu0 %35 }
  0x95   :  { %v39_v8 = vmul.f32 0.03125, %v36_v7  ;;  %v42_v9 = vmul.f32 %v40_v6, %v40_v6 }
  0x97   :  { %v41_v10 = vsub.f32 %v27_v1, %v39_v8  ;;  %v44_v11 = vsel %vm30_vm0, %v42_v9, 0.0 }
  0x98   :  { %45 = vadd.xlane.f32.xlu1 %v44_v11 }
  0x99   :  { %v43_v12 = vmul.f32 %v41_v10, %v41_v10 }
  0x9b   :  { %v47_v13 = vsel %vm30_vm0, %v43_v12, 0.0 }
  0x9c   :  { %48 = vadd.xlane.f32.xlu1 %v47_v13 }
 0x125   :  { %v46_v20 = vpop.xlane.xlu1 %45 }
 0x126   :  { %v50_v21 = vmul.f32 0.03125, %v46_v20 }
 0x128   :  { %v52_v22 = vadd.f32 1e-12, %v50_v21 }
 0x129   :  { %v49_v23 = vpop.xlane.xlu1 %48 }
 0x12a   :  { %3401 = vrsqrt.f32 %v52_v22  ;;  %v51_v24 = vmul.f32 0.03125, %v49_v23 }
 0x12c   :  { %v53_v25 = vadd.f32 1e-12, %v51_v24 }
 0x12e   :  { %3403 = vrsqrt.f32 %v53_v25 }
 0x134   :  { %v3402_v26 = vpop.eup %3401 }
 0x135   :  { %v56_v28 = vmul.f32 %v3402_v26, %v40_v6 }
 0x137   :  { %v62_v30 = vmul.f32 %v2880_v27, %v56_v28 }
 0x138   :  { %v3404_v31 = vpop.eup %3403 }
 0x139   :  { %v57_v32 = vmul.f32 %v3404_v31, %v41_v10  ;;  %v3580_v33 = vadd.f32 %v2881_v29, %v62_v30 }
 0x13b   :  { %v63_v34 = vmul.f32 %v2880_v27, %v57_v32  ;;  %3069 = vmatprep.mubr.msk.f32.mxu0 %vm30_vm0, %v3580_v33 }
 0x13d   :  { %v3584_v35 = vadd.f32 %v2881_v29, %v63_v34 }
 0x13f   :  { %3070 = vmatmul.mubr.msk.f32.vlgmr.msra.gmra.mrb[0].mxu0 %vm30_vm0, %v3584_v35 }
 0x140   :  { %3084 = vmatprep.mubr.msk.f32.mxu0 %vm3482_vm1, %v3481_v36 }
 0x212   :  { %v3071_v38 = vpop.f32.mrb[0].mxu0 }
 0x213   :  { %v3597_v39 = vadd.f32 %v3071_v38, %v2882_v37  ;;  %v151_v40 = vpop.f32.mrb[1].mxu0 }
 0x214   :  { %v3599_v41 = vadd.f32 %v2882_v37, %v151_v40 }
 0x215   :  { %241 = vrot.lane.b32.xlu1 %v3597_v39, %s3483_s18 }
 0x216   :  { %163 = vrot.lane.b32.xlu0 %v3599_v41, %s3483_s18 }
 0x287   :  { %v242_v43 = vpop.permute.xlu1 %241 }
 0x288   :  { %v164_v42 = vpop.permute.xlu0 %163 }
 0x289   :  { %3073 = vmatpush3.xpose.msk.msra.mxu1 %vm165_vm2, %v164_v42 }
 0x28a   :  { %3077 = vmatprep.subr.mxu1 %v3481_v36 }
 0x28c   :  { %3075 = vmatmul.mubr.msk.f32.vlgmr.msra.gmra.mrb[0].mxu1 %vm165_vm2, %v3599_v41 }
 0x28d   :  { %3078 = vmatpush3.xpose.msk.msra.mxu1 %vm165_vm2, %v242_v43  ;;  %3079 = vmatprep.mubr.msk.f32.mxu1 %vm3482_vm1, %v3481_v36 }
 0x28e   :  { %3087 = vmatprep.subr.mxu1 %v3481_v36 }
 0x290   :  { %3080 = vmatmul.mubr.msk.f32.vlgmr.msra.gmra.mrb[2].mxu1 %vm165_vm2, %v3597_v39 }
 0x291   :  { %3089 = vmatprep.mubr.msk.f32.mxu1 %vm3482_vm1, %v3481_v36 }
 0x35f   :  { %v236_v44 = vpop.f32.mrb[0].mxu1 }
 0x360   :  { %v317_v46 = vmul.f32 0.35355338, %v236_v44  ;;  %v3076_v47 = vpop.f32.mrb[1].mxu1 }
 0x362   :  { %v331_v48 = vadd.f32 %v3618_v45, %v317_v46 }
 0x363   :  { %v313_v49 = vpop.f32.mrb[2].mxu1 }
 0x364   :  { %v318_v51 = vmul.f32 0.35355338, %v313_v49  ;;  %v3081_v52 = vpop.f32.mrb[3].mxu1  ;;  %v333_v53 = vsel %vm165_vm2, %v331_v48, -inf }
 0x365   :  { %334 = vmax.xlane.f32.xlu1 %v333_v53 }
 0x366   :  { %v332_v54 = vadd.f32 %v3624_v50, %v318_v51 }
 0x368   :  { %v336_v55 = vsel %vm165_vm2, %v332_v54, -inf }
 0x369   :  { %337 = vmax.xlane.f32.xlu0 %v336_v55 }
 0x376   :  { %431 = vrot.lane.b32.xlu1 %v3597_v39, %s3484_s23 }
 0x37a   :  { %509 = vrot.lane.b32.xlu1 %v3599_v41, %s3485_s24 }
 0x37e   :  { %587 = vrot.lane.b32.xlu1 %v3597_v39, %s3485_s24 }
 0x37f   :  { %355 = vrot.lane.b32.xlu0 %v3599_v41, %s3484_s23 }
 0x3f2   :  { %v335_v56 = vpop.xlane.xlu1 %334 }
 0x3f3   :  { %v339_v57 = vsub.f32 %v331_v48, %v335_v56 }
 0x3f5   :  { %v341_v58 = vmul.f32 1.442695, %v339_v57 }
 0x3f6   :  { %v432_v59 = vpop.permute.xlu1 %431  ;;  %v338_v60 = vpop.xlane.xlu0 %337 }
 0x3f7   :  { %3405 = vpow2.f32 %v341_v58  ;;  %v340_v61 = vsub.f32 %v332_v54, %v338_v60  ;;  %3088 = vmatpush3.msra.mxu1 %v432_v59 }
 0x3f8   :  { %3097 = vmatprep.subr.mxu1 %v3481_v36 }
 0x3f9   :  { %v343_v62 = vmul.f32 1.442695, %v340_v61 }
 0x3fa   :  { %v356_v63 = vpop.permute.xlu0 %355  ;;  %v510_v4 = vpop.permute.xlu1 %509 }
 0x3fb   :  { %3407 = vpow2.f32 %v343_v62  ;;  %3083 = vmatpush3.msra.mxu0 %v356_v63 }
 0x3fc   :  { %3092 = vmatprep.subr.mxu0 %v3481_v36 }
 0x3fe   :  { %v588_v5 = vpop.permute.xlu1 %587 }
 0x401   :  { %v3406_v0 = vpop.eup %3405 }
 0x402   :  { %v345_v1 = vsel %vm165_vm2, %v3406_v0, 0.0 }
 0x403   :  { %346 = vadd.xlane.f32.xlu0 %v345_v1 }
 0x405   :  { %v3408_v2 = vpop.eup %3407 }
 0x406   :  { %v348_v3 = vsel %vm165_vm2, %v3408_v2, 0.0 }
 0x407   :  { %349 = vadd.xlane.f32.xlu1 %v348_v3 }
 0x418   :  { %585 = vrot.lane.b32.xlu1 %v3597_v39, %s3486_s1 }
 0x419   :  { %507 = vrot.lane.b32.xlu0 %v3599_v41, %s3486_s1 }
 0x490   :  { %v347_v6 = vpop.xlane.xlu0 %346 }
 0x491   :  { %3409 = vrcp.f32 %v347_v6 }
 0x494   :  { %v350_v7 = vpop.xlane.xlu1 %349  ;;  %v508_v12 = vpop.permute.xlu0 %507 }
 0x495   :  { %3411 = vrcp.f32 %v350_v7 }
 0x498   :  { %v586_v13 = vpop.permute.xlu1 %585 }
 0x49b   :  { %v3410_v8 = vpop.eup %3409 }
 0x49c   :  { %v352_v9 = vmul.f32 %v3410_v8, %v3406_v0 }
 0x49e   :  { %3085 = vmatmul.mubr.msk.f32.vlgmr.msra.gmra.mrb[2].mxu0 %vm165_vm2, %v352_v9 }
 0x49f   :  { %v3412_v10 = vpop.eup %3411  ;;  %3093 = vmatpush3.xpose.msk.msra.mxu0 %vm165_vm2, %v510_v4  ;;  %3094 = vmatprep.mubr.msk.f32.mxu0 %vm3482_vm1, %v3481_v36 }
 0x4a0   :  { %v354_v11 = vmul.f32 %v3412_v10, %v3408_v2  ;;  %3102 = vmatprep.subr.mxu0 %v3481_v36 }
 0x4a2   :  { %3090 = vmatmul.mubr.msk.f32.vlgmr.msra.gmra.mrb[4].mxu1 %vm165_vm2, %v354_v11  ;;  %3095 = vmatmul.mubr.msk.f32.vlgmr.msra.gmra.mrb[4].mxu0 %vm165_vm2, %v508_v12 }
 0x4a3   :  { %3098 = vmatpush3.xpose.msk.msra.mxu1 %vm165_vm2, %v588_v5  ;;  %3099 = vmatprep.mubr.msk.f32.mxu1 %vm3482_vm1, %v3481_v36 }
 0x4a4   :  { %3107 = vmatprep.subr.mxu1 %v3481_v36  ;;  %3104 = vmatprep.mubr.msk.f32.mxu0 %vm3482_vm1, %v3481_v36 }
 0x4a6   :  { %3100 = vmatmul.mubr.msk.f32.vlgmr.msra.gmra.mrb[6].mxu1 %vm165_vm2, %v586_v13 }
 0x4a7   :  { %3109 = vmatprep.mubr.msk.f32.mxu1 %vm3482_vm1, %v3481_v36 }
 0x571   :  { %v3657_v17 = vpop.f32.mrb[2].mxu0 }
 0x572   :  { %v3086_v19 = vpop.f32.mrb[3].mxu0 }
 0x575   :  { %v3659_v20 = vpop.f32.mrb[4].mxu1  ;;  %v581_v21 = vpop.f32.mrb[4].mxu0 }
 0x576   :  { %v663_v22 = vmul.f32 0.35355338, %v581_v21  ;;  %v3091_v23 = vpop.f32.mrb[5].mxu1  ;;  %v3096_v24 = vpop.f32.mrb[5].mxu0 }
 0x578   :  { %v665_v25 = vadd.f32 %v3618_v45, %v663_v22 }
 0x579   :  { %v659_v26 = vpop.f32.mrb[6].mxu1 }
 0x57a   :  { %v664_v27 = vmul.f32 0.35355338, %v659_v26  ;;  %v3101_v28 = vpop.f32.mrb[7].mxu1  ;;  %v667_v29 = vsel %vm165_vm2, %v665_v25, -inf }
 0x57b   :  { %668 = vmax.xlane.f32.xlu0 %v667_v29 }
 0x57c   :  { %v666_v30 = vadd.f32 %v3624_v50, %v664_v27 }
 0x57e   :  { %v670_v31 = vsel %vm165_vm2, %v666_v30, -inf }
 0x57f   :  { %671 = vmax.xlane.f32.xlu1 %v670_v31 }
 0x590   :  { %765 = vrot.lane.b32.xlu1 %v3597_v39, %s3487_s25 }
 0x591   :  { %689 = vrot.lane.b32.xlu0 %v3599_v41, %s3487_s25 }
 0x594   :  { %843 = vrot.lane.b32.xlu1 %v3599_v41, %s3488_s26 }
 0x598   :  { %921 = vrot.lane.b32.xlu1 %v3597_v39, %s3488_s26 }
 0x59c   :  { %919 = vrot.lane.b32.xlu1 %v3597_v39, %s3489_s27 }
 0x608   :  { %v669_v32 = vpop.xlane.xlu0 %668 }
 0x609   :  { %v673_v34 = vsub.f32 %v665_v25, %v669_v32 }
 0x60b   :  { %v675_v37 = vmul.f32 1.442695, %v673_v34 }
 0x60c   :  { %v690_v38 = vpop.permute.xlu0 %689  ;;  %v672_v40 = vpop.xlane.xlu1 %671 }
 0x60d   :  { %3413 = vpow2.f32 %v675_v37  ;;  %v674_v42 = vsub.f32 %v666_v30, %v672_v40  ;;  %3103 = vmatpush3.msra.mxu0 %v690_v38 }
 0x60e   :  { %3112 = vmatprep.subr.mxu0 %v3481_v36 }
 0x60f   :  { %v677_v43 = vmul.f32 1.442695, %v674_v42 }
 0x610   :  { %v766_v44 = vpop.permute.xlu1 %765 }
 0x611   :  { %3415 = vpow2.f32 %v677_v43  ;;  %3108 = vmatpush3.msra.mxu1 %v766_v44 }
 0x612   :  { %3117 = vmatprep.subr.mxu1 %v3481_v36 }
 0x614   :  { %v844_v53 = vpop.permute.xlu1 %843 }
 0x617   :  { %v3414_v46 = vpop.eup %3413 }
 0x618   :  { %v679_v47 = vsel %vm165_vm2, %v3414_v46, 0.0  ;;  %v922_v57 = vpop.permute.xlu1 %921 }
 0x619   :  { %680 = vadd.xlane.f32.xlu0 %v679_v47 }
 0x61b   :  { %v3416_v48 = vpop.eup %3415 }
 0x61c   :  { %v682_v49 = vsel %vm165_vm2, %v3416_v48, 0.0  ;;  %v920_v60 = vpop.permute.xlu1 %919 }
 0x61d   :  { %683 = vadd.xlane.f32.xlu0 %v682_v49 }
 0x633   :  { %841 = vrot.lane.b32.xlu0 %v3599_v41, %s3489_s27 }
 0x6a6   :  { %v681_v51 = vpop.xlane.xlu0 %680 }
 0x6a7   :  { %3417 = vrcp.f32 %v681_v51 }
 0x6aa   :  { %v684_v52 = vpop.xlane.xlu0 %683 }
 0x6ab   :  { %3419 = vrcp.f32 %v684_v52 }
 0x6ae   :  { %v842_v59 = vpop.permute.xlu0 %841 }
 0x6b1   :  { %v3418_v54 = vpop.eup %3417 }
 0x6b2   :  { %v686_v55 = vmul.f32 %v3418_v54, %v3414_v46 }
 0x6b4   :  { %3105 = vmatmul.mubr.msk.f32.vlgmr.msra.gmra.mrb[6].mxu0 %vm165_vm2, %v686_v55 }
 0x6b5   :  { %v3420_v56 = vpop.eup %3419  ;;  %3113 = vmatpush3.xpose.msk.msra.mxu0 %vm165_vm2, %v844_v53  ;;  %3114 = vmatprep.mubr.msk.f32.mxu0 %vm3482_vm1, %v3481_v36 }
 0x6b6   :  { %v688_v58 = vmul.f32 %v3420_v56, %v3416_v48  ;;  %3122 = vmatprep.subr.mxu0 %v3481_v36 }
 0x6b8   :  { %3110 = vmatmul.mubr.msk.f32.vlgmr.msra.gmra.mrb[8].mxu1 %vm165_vm2, %v688_v58  ;;  %3115 = vmatmul.mubr.msk.f32.vlgmr.msra.gmra.mrb[8].mxu0 %vm165_vm2, %v842_v59 }
 0x6b9   :  { %3118 = vmatpush3.xpose.msk.msra.mxu1 %vm165_vm2, %v922_v57  ;;  %3119 = vmatprep.mubr.msk.f32.mxu1 %vm3482_vm1, %v3481_v36 }
 0x6ba   :  { %3127 = vmatprep.subr.mxu1 %v3481_v36  ;;  %3124 = vmatprep.mubr.msk.f32.mxu0 %vm3482_vm1, %v3481_v36 }
 0x6bc   :  { %3120 = vmatmul.mubr.msk.f32.vlgmr.msra.gmra.mrb[10].mxu1 %vm165_vm2, %v920_v60  ;;  %v3381_v60 = vpack.i.bf16 %v3558_v15, %v3553_v14 }
 0x6bd   :  { %3129 = vmatprep.mubr.msk.f32.mxu1 %vm3482_vm1, %v3481_v36 }
 0x787   :  { %v3691_v61 = vpop.f32.mrb[6].mxu0 }
 0x788   :  { %v3106_v62 = vpop.f32.mrb[7].mxu0 }
 0x78b   :  { %v3693_v63 = vpop.f32.mrb[8].mxu1  ;;  %v915_v0 = vpop.f32.mrb[8].mxu0 }
 0x78c   :  { %v997_v1 = vmul.f32 0.35355338, %v915_v0  ;;  %v3111_v2 = vpop.f32.mrb[9].mxu1  ;;  %v3116_v3 = vpop.f32.mrb[9].mxu0 }
 0x78e   :  { %v999_v4 = vadd.f32 %v3618_v45, %v997_v1 }
 0x78f   :  { %v993_v5 = vpop.f32.mrb[10].mxu1 }
 0x790   :  { %v998_v6 = vmul.f32 0.35355338, %v993_v5  ;;  %v3121_v7 = vpop.f32.mrb[11].mxu1  ;;  %v1001_v8 = vsel %vm165_vm2, %v999_v4, -inf }
 0x791   :  { %1002 = vmax.xlane.f32.xlu0 %v1001_v8 }
 0x792   :  { %v1000_v9 = vadd.f32 %v3624_v50, %v998_v6 }
 0x794   :  { %v1004_v10 = vsel %vm165_vm2, %v1000_v9, -inf }
 0x795   :  { %1005 = vmax.xlane.f32.xlu1 %v1004_v10 }
 0x7a6   :  { %1099 = vrot.lane.b32.xlu1 %v3597_v39, %s3490_s0 }
 0x7a7   :  { %1023 = vrot.lane.b32.xlu0 %v3599_v41, %s3490_s0 }
 0x7aa   :  { %1177 = vrot.lane.b32.xlu1 %v3599_v41, %s3491_s28 }
 0x7ae   :  { %1255 = vrot.lane.b32.xlu1 %v3597_v39, %s3491_s28 }
 0x7b2   :  { %1253 = vrot.lane.b32.xlu1 %v3597_v39, %s3492_s29 }
 0x81e   :  { %v1003_v11 = vpop.xlane.xlu0 %1002 }
 0x81f   :  { %v1007_v12 = vsub.f32 %v999_v4, %v1003_v11 }
 0x821   :  { %v1009_v13 = vmul.f32 1.442695, %v1007_v12 }
 0x822   :  { %v1024_v19 = vpop.permute.xlu0 %1023  ;;  %v1006_v21 = vpop.xlane.xlu1 %1005 }
 0x823   :  { %3421 = vpow2.f32 %v1009_v13  ;;  %v1008_v22 = vsub.f32 %v1000_v9, %v1006_v21  ;;  %3123 = vmatpush3.msra.mxu0 %v1024_v19 }
 0x824   :  { %3132 = vmatprep.subr.mxu0 %v3481_v36 }
 0x825   :  { %v1011_v23 = vmul.f32 1.442695, %v1008_v22 }
 0x826   :  { %v1100_v24 = vpop.permute.xlu1 %1099 }
 0x827   :  { %3423 = vpow2.f32 %v1011_v23  ;;  %3128 = vmatpush3.msra.mxu1 %v1100_v24 }
 0x828   :  { %3137 = vmatprep.subr.mxu1 %v3481_v36 }
 0x82a   :  { %v1178_v31 = vpop.permute.xlu1 %1177 }
 0x82d   :  { %v3422_v25 = vpop.eup %3421 }
 0x82e   :  { %v1013_v26 = vsel %vm165_vm2, %v3422_v25, 0.0  ;;  %v1256_v38 = vpop.permute.xlu1 %1255 }
 0x82f   :  { %1014 = vadd.xlane.f32.xlu0 %v1013_v26 }
 0x831   :  { %v3424_v27 = vpop.eup %3423 }
 0x832   :  { %v1016_v28 = vsel %vm165_vm2, %v3424_v27, 0.0  ;;  %v1254_v43 = vpop.permute.xlu1 %1253 }
 0x833   :  { %1017 = vadd.xlane.f32.xlu0 %v1016_v28 }
 0x849   :  { %1175 = vrot.lane.b32.xlu0 %v3599_v41, %s3492_s29 }
 0x8bc   :  { %v1015_v29 = vpop.xlane.xlu0 %1014 }
 0x8bd   :  { %3425 = vrcp.f32 %v1015_v29 }
 0x8c0   :  { %v1018_v30 = vpop.xlane.xlu0 %1017 }
 0x8c1   :  { %3427 = vrcp.f32 %v1018_v30 }
 0x8c4   :  { %v1176_v42 = vpop.permute.xlu0 %1175 }
 0x8c7   :  { %v3426_v32 = vpop.eup %3425 }
 0x8c8   :  { %v1020_v34 = vmul.f32 %v3426_v32, %v3422_v25 }
 0x8ca   :  { %3125 = vmatmul.mubr.msk.f32.vlgmr.msra.gmra.mrb[10].mxu0 %vm165_vm2, %v1020_v34 }
 0x8cb   :  { %v3428_v37 = vpop.eup %3427  ;;  %3133 = vmatpush3.xpose.msk.msra.mxu0 %vm165_vm2, %v1178_v31  ;;  %3134 = vmatprep.mubr.msk.f32.mxu0 %vm3482_vm1, %v3481_v36 }
 0x8cc   :  { %v1022_v40 = vmul.f32 %v3428_v37, %v3424_v27  ;;  %3142 = vmatprep.subr.mxu0 %v3481_v36 }
 0x8ce   :  { %3130 = vmatmul.mubr.msk.f32.vlgmr.msra.gmra.mrb[12].mxu1 %vm165_vm2, %v1022_v40  ;;  %3135 = vmatmul.mubr.msk.f32.vlgmr.msra.gmra.mrb[12].mxu0 %vm165_vm2, %v1176_v42 }
 0x8cf   :  { %3138 = vmatpush3.xpose.msk.msra.mxu1 %vm165_vm2, %v1256_v38  ;;  %3139 = vmatprep.mubr.msk.f32.mxu1 %vm3482_vm1, %v3481_v36 }
 0x8d0   :  { %3147 = vmatprep.subr.mxu1 %v3481_v36  ;;  %3144 = vmatprep.mubr.msk.f32.mxu0 %vm3482_vm1, %v3481_v36 }
 0x8d2   :  { %3140 = vmatmul.mubr.msk.f32.vlgmr.msra.gmra.mrb[14].mxu1 %vm165_vm2, %v1254_v43 }
 0x8d3   :  { %3149 = vmatprep.mubr.msk.f32.mxu1 %vm3482_vm1, %v3481_v36 }
 0x99d   :  { %v1095_v44 = vpop.f32.mrb[10].mxu0 }
 0x99e   :  { %v3126_v46 = vpop.f32.mrb[11].mxu0 }
 0x9a1   :  { %v1171_v47 = vpop.f32.mrb[12].mxu1  ;;  %v1249_v48 = vpop.f32.mrb[12].mxu0 }
 0x9a2   :  { %v1331_v49 = vmul.f32 0.35355338, %v1249_v48  ;;  %v3131_v51 = vpop.f32.mrb[13].mxu1  ;;  %v3136_v52 = vpop.f32.mrb[13].mxu0 }
 0x9a4   :  { %v1333_v53 = vadd.f32 %v3618_v45, %v1331_v49  ;;  %v3386_v45 = vpack.i.bf16 %v3570_v18, %v3563_v16 }
 0x9a5   :  { %v1327_v54 = vpop.f32.mrb[14].mxu1 }
 0x9a6   :  { %v1332_v55 = vmul.f32 0.35355338, %v1327_v54  ;;  %v3141_v56 = vpop.f32.mrb[15].mxu1  ;;  %v1335_v57 = vsel %vm165_vm2, %v1333_v53, -inf }
 0x9a7   :  { %1336 = vmax.xlane.f32.xlu0 %v1335_v57 }
 0x9a8   :  { %v1334_v58 = vadd.f32 %v3624_v50, %v1332_v55 }
 0x9aa   :  { %v1338_v59 = vsel %vm165_vm2, %v1334_v58, -inf }
 0x9ab   :  { %1339 = vmax.xlane.f32.xlu1 %v1338_v59 }
 0x9bc   :  { %1433 = vrot.lane.b32.xlu1 %v3597_v39, %s3493_s30 }
 0x9c0   :  { %3382 = vrot.lane.b32.xlu1 %v3381_v60, %s3494_s8 }
 0x9c4   :  { %3387 = vrot.lane.b32.xlu1 %v3386_v45, %s3494_s8  ;;  %v3768_v45 = vld [vmem:[%s4019_s4 + $0x18] sm:$0xff] }
 0x9c8   :  { %1513 = vrot.lane.b32.xlu1 %v3693_v63, %s3495_s9 }
 0x9cc   :  { %1521 = vrot.lane.b32.xlu1 %v1171_v47, %s3496_s10 }
 0xa34   :  { %v1337_v50 = vpop.xlane.xlu0 %1336 }
 0xa35   :  { %v1341_v62 = vsub.f32 %v1333_v53, %v1337_v50 }
 0xa37   :  { %v1343_v0 = vmul.f32 1.442695, %v1341_v62  ;;  %v3775_v62 = vld [vmem:[%s4019_s4 + $0x28] sm:$0xff] }
 0xa38   :  { %v1340_v1 = vpop.xlane.xlu1 %1339 }
 0xa39   :  { %3429 = vpow2.f32 %v1343_v0  ;;  %v1342_v39 = vsub.f32 %v1334_v58, %v1340_v1  ;;  %v3780_v0 = vld [vmem:[%s4019_s4 + $0x38] sm:$0xff] }
 0xa3a   :  { %v3299_v1 = vpack.c.bf16 %v3780_v0, %v3775_v62 }
 0xa3b   :  { %v1345_v2 = vmul.f32 1.442695, %v1342_v39 }
 0xa3c   :  { %v1434_v3 = vpop.permute.xlu1 %1433 }
 0xa3d   :  { %3431 = vpow2.f32 %v1345_v2  ;;  %3148 = vmatpush3.msra.mxu1 %v1434_v3 }
 0xa40   :  { %v3383_v4 = vpop.permute.xlu1 %3382 }
 0xa41   :  { %v3385_v5 = vunpack.i.h.bf16 %v3383_v4  ;;  %v3384_v6 = vunpack.i.l.bf16 %v3383_v4 }
 0xa43   :  { %v3430_v14 = vpop.eup %3429  ;;  %v3287_v8 = vpack.c.bf16 %v3385_v5, %v3384_v6  ;;  %v2915_v5 = vld [vmem:[%s4020_s6 + $0x6b] ss:$0 sm:$0xff] }
 0xa44   :  { %v1347_v15 = vsel %vm165_vm2, %v3430_v14, 0.0  ;;  %v3388_v9 = vpop.permute.xlu1 %3387 }
 0xa45   :  { %1348 = vadd.xlane.f32.xlu0 %v1347_v15  ;;  %v3390_v10 = vunpack.i.h.bf16 %v3388_v9  ;;  %v3389_v11 = vunpack.i.l.bf16 %v3388_v9 }
 0xa47   :  { %v3432_v16 = vpop.eup %3431  ;;  %v3291_v19 = vpack.c.bf16 %v3390_v10, %v3389_v11 }
 0xa48   :  { %v1350_v18 = vsel %vm165_vm2, %v3432_v16, 0.0  ;;  %v1514_v27 = vpop.permute.xlu1 %1513 }
 0xa49   :  { %1351 = vadd.xlane.f32.xlu0 %v1350_v18  ;;  %v1534_v37 = vsel %vm165_vm2, %v3659_v20, %v1514_v27 }
 0xa4c   :  { %v1522_v30 = vpop.permute.xlu1 %1521 }
 0xa4d   :  { %v1537_v38 = vsel %vm1535_vm4, %v1534_v37, %v1522_v30 }
 0xa5f   :  { %1357 = vrot.lane.b32.xlu0 %v3599_v41, %s3493_s30 }
 0xa63   :  { %1511 = vrot.lane.b32.xlu0 %v3691_v61, %s3495_s9 }
 0xa67   :  { %1519 = vrot.lane.b32.xlu0 %v1095_v44, %s3496_s10 }
 0xad2   :  { %v1349_v63 = vpop.xlane.xlu0 %1348 }
 0xad3   :  { %3433 = vrcp.f32 %v1349_v63  ;;  %v2914_v63 = vld [vmem:[%s4020_s6 + $0x6a] ss:$0 sm:$0xff] }
 0xad6   :  { %v1352_v7 = vpop.xlane.xlu0 %1351 }
 0xad7   :  { %3435 = vrcp.f32 %v1352_v7 }
 0xada   :  { %v1358_v12 = vpop.permute.xlu0 %1357 }
 0xadb   :  { %3143 = vmatpush3.msra.mxu0 %v1358_v12  ;;  %v1797_v12 = vld [vmem:[%s4022_s5] sm:$0xff] }
 0xadc   :  { %3288 = vmatprep.subr.bf16.mxu0 %v3287_v8 }
 0xadd   :  { %v3434_v13 = vpop.eup %3433 }
 0xade   :  { %v1354_v41 = vmul.f32 %v3434_v13, %v3430_v14  ;;  %v1512_v26 = vpop.permute.xlu0 %1511  ;;  %v1798_v13 = vld [vmem:[%s4022_s5 + $0x8] sm:$0xff] }
 0xadf   :  { %v1533_v29 = vsel %vm165_vm2, %v3657_v17, %v1512_v26  ;;  %v2911_v17 = vld [vmem:[%s4020_s6 + $0x6f] ss:$0 sm:$0xff]  ;;  %v1804_v26 = vld [vmem:[%s4022_s5 + $0x38] sm:$0xff] }
 0xae0   :  { %3145 = vmatmul.mubr.msk.f32.vlgmr.msra.gmra.mrb[14].mxu0 %vm165_vm2, %v1354_v41  ;;  %v1799_v41 = vld [vmem:[%s4022_s5 + $0x10] sm:$0xff] }
 0xae1   :  { %v3436_v61 = vpop.eup %3435  ;;  %3290 = vmatpush3.bf16.msra.mxu0 %v3287_v8 }
 0xae2   :  { %v1356_v21 = vmul.f32 %v3436_v61, %v3432_v16  ;;  %3292 = vmatprep.subr.bf16.mxu0 %v3291_v19  ;;  %v1520_v28 = vpop.permute.xlu0 %1519  ;;  %v1800_v61 = vld [vmem:[%s4022_s5 + $0x18] sm:$0xff] }
 0xae3   :  { %v1536_v31 = vsel %vm1535_vm4, %v1533_v29, %v1520_v28  ;;  %v2916_v28 = vld [vmem:[%s4020_s6 + $0x70] ss:$0 sm:$0xff] }
 0xae4   :  { %3150 = vmatmul.mubr.msk.f32.vlgmr.msra.gmra.mrb[16].mxu1 %vm165_vm2, %v1356_v21  ;;  %v3307_v21 = vpack.c.bf16 %v1800_v61, %v1799_v41 }
 0xae5   :  { %3294 = vmatpush3.bf16.msra.mxu0 %v3291_v19  ;;  %v3303_v19 = vpack.c.bf16 %v1798_v13, %v1797_v12 }
 0xbb3   :  { %v1429_v22 = vpop.f32.mrb[14].mxu0 }
 0xbb4   :  { %1527 = vrot.lane.b32.xlu0 %v1429_v22, %s3497_s11  ;;  %v3146_v23 = vpop.f32.mrb[15].mxu0  ;;  %v1801_v22 = vld [vmem:[%s4022_s5 + $0x20] sm:$0xff] }
 0xbb5   :  { %v1802_v23 = vld [vmem:[%s4022_s5 + $0x28] sm:$0xff] }
 0xbb7   :  { %v1505_v24 = vpop.f32.mrb[16].mxu1 }
 0xbb8   :  { %1529 = vrot.lane.b32.xlu1 %v1505_v24, %s3497_s11  ;;  %v3151_v25 = vpop.f32.mrb[17].mxu1  ;;  %v3311_v24 = vpack.c.bf16 %v1802_v23, %v1801_v22 }
 0xbb9   :  { %v1803_v25 = vld [vmem:[%s4022_s5 + $0x30] sm:$0xff] }
 0xbba   :  { %v3315_v27 = vpack.c.bf16 %v1804_v26, %v1803_v25 }
 0xc26   :  { %v1528_v32 = vpop.permute.xlu0 %1527 }
 0xc27   :  { %v1539_v34 = vsel %vm1538_vm3, %v1536_v31, %v1528_v32 }
 0xc28   :  { %3160 = vmatprep.mubr.msk.f32.mxu0 %vm30_vm0, %v1539_v34 }
 0xc2a   :  { %v1530_v40 = vpop.permute.xlu1 %1529 }
 0xc2b   :  { %v1540_v42 = vsel %vm1538_vm3, %v1537_v38, %v1530_v40 }
 0xc2c   :  { %3161 = vmatmul.mubr.msk.f32.vlgmr.msra.gmra.mrb[16].mxu0 %vm30_vm0, %v1540_v42 }
 0xcff   :  { %v3162_v43 = vpop.f32.mrb[16].mxu0 }
 0xd00   :  { %v1644_v44 = vadd.f32 %v3162_v43, %v2911_v17  ;;  %v1638_v46 = vpop.f32.mrb[17].mxu0 }
 0xd01   :  { %v1639_v47 = vadd.f32 %v2911_v17, %v1638_v46 }
 0xd02   :  { %v1648_v48 = vadd.f32 %v1644_v44, %v3584_v35 }
 0xd03   :  { %v1647_v49 = vadd.f32 %v1639_v47, %v3580_v33  ;;  %v3763_v33 = vld [vmem:[%s4019_s4 + $0x8] sm:$0xff] }
 0xd04   :  { %v1654_v20 = vsel %vm30_vm0, %v1648_v48, 0.0  ;;  %v3295_v50 = vpack.c.bf16 %v3768_v45, %v3763_v33 }
 0xd05   :  { %1655 = vadd.xlane.f32.xlu1 %v1654_v20  ;;  %v1651_v51 = vsel %vm30_vm0, %v1647_v49, 0.0 }
 0xd06   :  { %1652 = vadd.xlane.f32.xlu0 %v1651_v51  ;;  %3296 = vmatprep.subr.bf16.mxu0 %v3295_v50 }
 0xd07   :  { %3298 = vmatpush3.bf16.msra.mxu0 %v3295_v50 }
 0xd08   :  { %3300 = vmatprep.subr.bf16.mxu0 %v3299_v1 }
 0xd0b   :  { %3302 = vmatpush3.bf16.msra.mxu0 %v3299_v1 }
 0xd0c   :  { %3304 = vmatprep.subr.bf16.mxu0 %v3303_v19 }
 0xd92   :  { %v1656_v52 = vpop.xlane.xlu1 %1655 }
 0xd93   :  { %v1658_v53 = vmul.f32 0.03125, %v1656_v52  ;;  %v1653_v54 = vpop.xlane.xlu0 %1652 }
 0xd94   :  { %v1657_v55 = vmul.f32 0.03125, %v1653_v54 }
 0xd95   :  { %v1660_v56 = vsub.f32 %v1648_v48, %v1658_v53 }
 0xd96   :  { %v1659_v57 = vsub.f32 %v1647_v49, %v1657_v55 }
 0xd97   :  { %v1662_v60 = vmul.f32 %v1660_v56, %v1660_v56 }
 0xd98   :  { %v1661_v58 = vmul.f32 %v1659_v57, %v1659_v57 }
 0xd99   :  { %v1666_v35 = vsel %vm30_vm0, %v1662_v60, 0.0 }
 0xd9a   :  { %v1663_v59 = vsel %vm30_vm0, %v1661_v58, 0.0 }
 0xd9b   :  { %1664 = vadd.xlane.f32.xlu0 %v1663_v59 }
 0xd9f   :  { %1667 = vadd.xlane.f32.xlu0 %v1666_v35 }
 0xe28   :  { %v1665_v39 = vpop.xlane.xlu0 %1664 }
 0xe29   :  { %v1669_v2 = vmul.f32 0.03125, %v1665_v39 }
 0xe2b   :  { %v1671_v3 = vadd.f32 1e-12, %v1669_v2 }
 0xe2c   :  { %v1668_v14 = vpop.xlane.xlu0 %1667 }
 0xe2d   :  { %3437 = vrsqrt.f32 %v1671_v3  ;;  %v1670_v15 = vmul.f32 0.03125, %v1668_v14 }
 0xe2f   :  { %v1672_v16 = vadd.f32 1e-12, %v1670_v15 }
 0xe31   :  { %3439 = vrsqrt.f32 %v1672_v16 }
 0xe37   :  { %v3438_v18 = vpop.eup %3437 }
 0xe38   :  { %v1675_v4 = vmul.f32 %v3438_v18, %v1659_v57 }
 0xe3a   :  { %v1681_v6 = vmul.f32 %v2914_v63, %v1675_v4 }
 0xe3b   :  { %v3440_v7 = vpop.eup %3439 }
 0xe3c   :  { %v1676_v8 = vmul.f32 %v3440_v7, %v1660_v56  ;;  %v1687_v9 = vadd.f32 %v2915_v5, %v1681_v6  ;;  %v2919_v56 = vld [vmem:[%s4020_s6 + $0x71] ss:$0 sm:$0xff]  ;;  %v3396_v7 = vpack.i.bf16 %v3780_v0, %v3775_v62 }
 0xe3e   :  { %v1682_v10 = vmul.f32 %v2914_v63, %v1676_v8  ;;  %3171 = vmatprep.mubr.msk.f32.mxu0 %vm30_vm0, %v1687_v9  ;;  %v3391_v8 = vpack.i.bf16 %v3768_v45, %v3763_v33  ;;  %v2922_v45 = vld [vmem:[%s4020_s6 + $0x6c] ss:$0 sm:$0xff] }
 0xe40   :  { %v1688_v11 = vadd.f32 %v2915_v5, %v1682_v10 }
 0xe42   :  { %3172 = vmatmul.mubr.msk.f32.vlgmr.msra.gmra.mrb[18].mxu0 %vm30_vm0, %v1688_v11 }
 0xe43   :  { %3306 = vmatpush3.bf16.msra.mxu0 %v3303_v19 }
 0xe44   :  { %3308 = vmatprep.subr.bf16.mxu0 %v3307_v21 }
 0xe47   :  { %3310 = vmatpush3.bf16.msra.mxu0 %v3307_v21 }
 0xe48   :  { %3312 = vmatprep.subr.bf16.mxu0 %v3311_v24 }
 0xe4b   :  { %3314 = vmatpush3.bf16.msra.mxu0 %v3311_v24 }
 0xe4c   :  { %3316 = vmatprep.subr.bf16.mxu0 %v3315_v27 }
 0xe4f   :  { %3318 = vmatpush3.bf16.msra.mxu0 %v3315_v27  ;;  %v2923_v27 = vld [vmem:[%s4020_s6 + $0x6d] ss:$0 sm:$0xff] }
 0xf15   :  { %v3173_v29 = vpop.f32.mrb[18].mxu0 }
 0xf16   :  { %v1776_v30 = vadd.f32 %v3173_v29, %v2916_v28  ;;  %v1770_v31 = vpop.f32.mrb[19].mxu0 }
 0xf17   :  { %v1771_v32 = vadd.f32 %v2916_v28, %v1770_v31 }
 0xf18   :  { %v1780_v34 = vmul.f32 %v1776_v30, %v1776_v30 }
 0xf19   :  { %v1779_v37 = vmul.f32 %v1771_v32, %v1771_v32 }
 0xf1a   :  { %v1782_v38 = vmul.f32 %v1780_v34, %v1776_v30 }
 0xf1b   :  { %v1781_v40 = vmul.f32 %v1779_v37, %v1771_v32  ;;  %v3498_v37 = vmov 0.0|0.0  }
 0xf1c   :  { %v1784_v42 = vmul.f32 0.044715, %v1782_v38  ;;  %v2924_v38 = vld [vmem:[%s4020_s6 + $0x72] ss:$0 sm:$0xff] }
 0xf1d   :  { %v1783_v17 = vmul.f32 0.044715, %v1781_v40 }
 0xf1e   :  { %v1786_v43 = vadd.f32 %v1784_v42, %v1776_v30 }
 0xf1f   :  { %v1785_v44 = vadd.f32 %v1783_v17, %v1771_v32 }
 0xf20   :  { %v1788_v46 = vmul.f32 0.7978846, %v1786_v43 }
 0xf21   :  { %v1787_v47 = vmul.f32 0.7978846, %v1785_v44 }
 0xf22   :  { %3441 = vtanh.f32 %v1788_v46 }
 0xf23   :  { %3443 = vtanh.f32 %v1787_v47  ;;  %v1934_v47 = vld [vmem:[%s4020_s6] sm:$0xff] }
 0xf2c   :  { %v3442_v48 = vpop.eup %3441 }
 0xf2d   :  { %v3444_v49 = vpop.eup %3443  ;;  %v1792_v20 = vadd.f32 1.0, %v3442_v48  ;;  %v1935_v48 = vld [vmem:[%s4020_s6 + $0x8] sm:$0xff] }
 0xf2e   :  { %v1791_v51 = vadd.f32 1.0, %v3444_v49 }
 0xf2f   :  { %v1794_v52 = vmul.f32 0.5, %v1792_v20  ;;  %v2042_v20 = vld [vmem:[%s4020_s6 + $0x60] sm:$0x3] }
 0xf30   :  { %v1793_v53 = vmul.f32 0.5, %v1791_v51  ;;  %v3854_v51 = vpack.c.bf16 %v1935_v48, %v1934_v47 }
 0xf31   :  { %v1796_v55 = vmul.f32 %v1794_v52, %v1776_v30  ;;  %v1936_v52 = vld [vmem:[%s4020_s6 + $0x10] sm:$0xff] }
 0xf32   :  { %v1795_v54 = vmul.f32 %v1793_v53, %v1771_v32  ;;  %v1937_v53 = vld [vmem:[%s4020_s6 + $0x18] sm:$0xff] }
 0xf34   :  { %3190 = vmatprep.mubr.msk.f32.mxu0 %vm1810_vm5, %v1795_v54  ;;  %v3864_v54 = vpack.c.bf16 %v1937_v53, %v1936_v52 }
 0xf35   :  { %3191 = vmatmul.mubr.msk.f32.vlgmr.msra.gmra.mrb[20].mxu0 %vm1810_vm5, %v1796_v55  ;;  %v2457_v55 = vld [vmem:[%s4020_s6 + $0x38] sm:$0xff] }
0x1008   :  { %v3192_v57 = vpop.f32.mrb[20].mxu0 }
0x1009   :  { %v1889_v58 = vadd.f32 %v3192_v57, %v2919_v56  ;;  %v1883_v59 = vpop.f32.mrb[21].mxu0 }
0x100a   :  { %v1884_v60 = vadd.f32 %v2919_v56, %v1883_v59  ;;  %v2458_v56 = vld [vmem:[%s4020_s6 + $0x40] sm:$0xff] }
0x100b   :  { %v1893_v35 = vadd.f32 %v1889_v58, %v1688_v11  ;;  %v3354_v57 = vpack.c.bf16 %v2458_v56, %v2457_v55  ;;  %v2189_v58 = vld [vmem:[%s4020_s6 + $0x50] sm:$0xff]  ;;  %v2443_v59 = vld [vmem:[%s4023_s3] sm:$0xff] }
0x100c   :  { %v1892_v50 = vadd.f32 %v1884_v60, %v1687_v9  ;;  %3226 = vmatprep.mubr.msk.f32.mxu0 %vm1535_vm4, %v2189_v58 }
0x100d   :  { %v1899_v1 = vsel %vm30_vm0, %v1893_v35, 0.0 }
0x100e   :  { %1900 = vadd.xlane.f32.xlu1 %v1899_v1  ;;  %v1896_v39 = vsel %vm30_vm0, %v1892_v50, 0.0  ;;  %v2444_v1 = vld [vmem:[%s4023_s3 + $0x8] sm:$0xff] }
0x100f   :  { %1897 = vadd.xlane.f32.xlu0 %v1896_v39  ;;  %v2445_v39 = vld [vmem:[%s4023_s3 + $0x10] sm:$0xff] }
0x109b   :  { %v1901_v2 = vpop.xlane.xlu1 %1900 }
0x109c   :  { %v1903_v3 = vmul.f32 0.03125, %v1901_v2  ;;  %v1898_v14 = vpop.xlane.xlu0 %1897  ;;  %v2446_v2 = vld [vmem:[%s4023_s3 + $0x18] sm:$0xff] }
0x109d   :  { %v1902_v15 = vmul.f32 0.03125, %v1898_v14  ;;  %v2448_v14 = vld [vmem:[%s4023_s3 + $0x28] sm:$0xff] }
0x109e   :  { %v1905_v16 = vsub.f32 %v1893_v35, %v1903_v3  ;;  %v2459_v35 = vld [vmem:[%s4020_s6 + $0x48] sm:$0xff]  ;;  %v2447_v3 = vld [vmem:[%s4023_s3 + $0x20] sm:$0xff] }
0x109f   :  { %v1904_v18 = vsub.f32 %v1892_v50, %v1902_v15  ;;  %v2449_v15 = vld [vmem:[%s4023_s3 + $0x30] sm:$0xff] }
0x10a0   :  { %v1907_v63 = vmul.f32 %v1905_v16, %v1905_v16 }
0x10a1   :  { %v1906_v4 = vmul.f32 %v1904_v18, %v1904_v18 }
0x10a2   :  { %v1911_v5 = vsel %vm30_vm0, %v1907_v63, 0.0  ;;  %v2452_v63 = vld [vmem:[%s4023_s3 + $0x48] sm:$0xff] }
0x10a3   :  { %1912 = vadd.xlane.f32.xlu1 %v1911_v5  ;;  %v1908_v6 = vsel %vm30_vm0, %v1906_v4, 0.0  ;;  %v2453_v4 = vld [vmem:[%s4023_s3 + $0x50] sm:$0xff]  ;;  %v2454_v5 = vld [vmem:[%s4023_s3 + $0x58] sm:$0xff] }
0x10a4   :  { %1909 = vadd.xlane.f32.xlu0 %v1908_v6  ;;  %v2455_v6 = vld [vmem:[%s4023_s3 + $0x60] sm:$0xff] }
0x10b4   :  { %3397 = vrot.lane.b32.xlu1 %v3396_v7, %s3484_s23  ;;  %v2456_v7 = vld [vmem:[%s4023_s3 + $0x68] sm:$0xff] }
0x10ba   :  { %3392 = vrot.lane.b32.xlu0 %v3391_v8, %s3484_s23  ;;  %v2274_v8 = vld [vmem:[%s4020_s6 + $0x20] sm:$0xff] }
0x1130   :  { %v1913_v9 = vpop.xlane.xlu1 %1912 }
0x1131   :  { %v1915_v10 = vmul.f32 0.03125, %v1913_v9  ;;  %v1910_v11 = vpop.xlane.xlu0 %1909  ;;  %v2275_v9 = vld [vmem:[%s4020_s6 + $0x28] sm:$0xf] }
0x1132   :  { %v1914_v12 = vmul.f32 0.03125, %v1910_v11  ;;  %v2272_v11 = vld [vmem:[%s4024_s2] sm:$0xff] }
0x1133   :  { %v1917_v13 = vadd.f32 1e-12, %v1915_v10  ;;  %v3340_v10 = vpack.c.bf16 %v2275_v9, %v2274_v8 }
0x1134   :  { %v1916_v19 = vadd.f32 1e-12, %v1914_v12  ;;  %v3398_v41 = vpop.permute.xlu1 %3397  ;;  %v2273_v12 = vld [vmem:[%s4024_s2 + $0x8] sm:$0x3f] }
0x1135   :  { %3445 = vrsqrt.f32 %v1917_v13  ;;  %v3393_v61 = vpop.permute.xlu0 %3392  ;;  %v3400_v21 = vunpack.i.h.bf16 %v3398_v41  ;;  %v3399_v22 = vunpack.i.l.bf16 %v3398_v41  ;;  %v2754_v41 = vld [vmem:[%s4020_s6 + $0x30] sm:$0xff] }
0x1136   :  { %3447 = vrsqrt.f32 %v1916_v19  ;;  %v3395_v62 = vunpack.i.h.bf16 %v3393_v61  ;;  %v3394_v0 = vunpack.i.l.bf16 %v3393_v61 }
0x1137   :  { %v3323_v24 = vpack.c.bf16 %v3400_v21, %v3399_v22  ;;  %v3969_v22 = vld [vmem:[%s4020_s6 + $0x73] ss:$0 sm:$0xff] }
0x1138   :  { %v3319_v23 = vpack.c.bf16 %v3395_v62, %v3394_v0 }
0x113a   :  { %3320 = vmatprep.subr.bf16.mxu1 %v3319_v23 }
0x113b   :  { %3322 = vmatpush3.bf16.msra.mxu1 %v3319_v23 }
0x113c   :  { %3324 = vmatprep.subr.bf16.mxu1 %v3323_v24 }
0x113f   :  { %v3446_v33 = vpop.eup %3445  ;;  %3326 = vmatpush3.bf16.msra.mxu1 %v3323_v24 }
0x1140   :  { %v3448_v25 = vpop.eup %3447  ;;  %v1921_v26 = vmul.f32 %v3446_v33, %v1905_v16  ;;  %3327 = vmatprep.subr.bf16.mxu1 %v3498_v37  ;;  %v2450_v16 = vld [vmem:[%s4023_s3 + $0x38] sm:$0xff] }
0x1141   :  { %v1920_v28 = vmul.f32 %v3448_v25, %v1904_v18  ;;  %v2451_v18 = vld [vmem:[%s4023_s3 + $0x40] sm:$0xff] }
0x1142   :  { %v1927_v29 = vmul.f32 %v2922_v45, %v1921_v26 }
0x1143   :  { %v1926_v30 = vmul.f32 %v2922_v45, %v1920_v28 }
0x1144   :  { %v1933_v31 = vadd.f32 %v2923_v27, %v1927_v29 }
0x1145   :  { %v1932_v32 = vadd.f32 %v2923_v27, %v1926_v30 }
0x1147   :  { %3201 = vmatprep.mubr.msk.f32.mxu1 %vm30_vm0, %v1932_v32  ;;  %v3336_v34 = vpack.c.bf16 %v1933_v31, %v1932_v32 }
0x1148   :  { %3202 = vmatmul.mubr.msk.f32.vlgmr.msra.gmra.mrb[18].mxu1 %vm30_vm0, %v1933_v31 }
0x1149   :  { %3337 = vmatprep.subr.bf16.mxu0 %v3336_v34  ;;  %3208 = vmatprep.mubr.msk.f32.mxu1 %vm3482_vm1, %v3481_v36 }
0x114a   :  { %3339 = vmatpush3.bf16.msra.mxu0 %v3336_v34 }
0x114b   :  { %3342 = vmatprep.subr.msk.bf16.mxu0 %vm3341_vm8, %v3340_v10 }
0x121b   :  { %v3203_v40 = vpop.f32.mrb[18].mxu1 }
0x121c   :  { %v2037_v42 = vadd.f32 %v3203_v40, %v2924_v38  ;;  %v2031_v17 = vpop.f32.mrb[19].mxu1 }
0x121d   :  { %v2032_v43 = vadd.f32 %v2924_v38, %v2031_v17 }
0x121e   :  { %3449 = vtanh.f32 %v2037_v42 }
0x121f   :  { %3451 = vtanh.f32 %v2032_v43 }
0x1228   :  { %v3450_v44 = vpop.eup %3449 }
0x1229   :  { %v3452_v46 = vpop.eup %3451 }
0x122a   :  { %v3328_v49 = vpack.c.bf16 %v3450_v44, %v3452_v46 }
0x122c   :  { %3329 = vmatpush3.bf16.msra.mxu1 %v3328_v49 }
0x122d   :  { %3330 = vmatprep.subr.bf16.mxu1 %v3498_v37 }
0x122f   :  { %3209 = vmatmul.mubr.msk.f32.vlgmr.msra.gmra.mrb[20].mxu1 %vm1535_vm4, %v2042_v20 }
0x1230   :  { %3332 = vmatpush3.bf16.msra.mxu1 %v3854_v51  ;;  %3219 = vmatprep.mubr.msk.f32.mxu1 %vm3482_vm1, %v3481_v36  ;;  %v2190_v36 = vld [vmem:[%s4020_s6 + $0x58] sm:$0x3f]  ;;  %vm2872_vm1 = vcmask 1045504  }
0x1231   :  { %3333 = vmatprep.subr.bf16.mxu1 %v3498_v37  ;;  %3227 = vmatmul.mubr.msk.f32.vlgmr.msra.gmra.mrb[22].mxu0 %vm1535_vm4, %v2190_v36 }
0x1232   :  { %3345 = vmatpush3.bf16.msk.msra.mxu0 %vm3341_vm8, %v3340_v10  ;;  %3233 = vmatprep.mubr.msk.f32.mxu0 %vm2276_vm9, %v2272_v11 }
0x1233   :  { %3347 = vmatprep.subr.bf16.mxu0 %v3854_v51 }
0x1234   :  { %3335 = vmatpush3.bf16.msra.mxu1 %v3864_v54 }
0x1235   :  { %3355 = vmatprep.subr.bf16.mxu1 %v3354_v57  ;;  %3234 = vmatmul.mubr.msk.f32.vlgmr.msra.gmra.mrb[24].mxu0 %vm2276_vm9, %v2273_v12 }
0x1236   :  { %3349 = vmatpush3.bf16.msra.mxu0 %v3854_v51 }
0x1237   :  { %3351 = vmatprep.subr.bf16.mxu0 %v3864_v54 }
0x123a   :  { %3353 = vmatpush3.bf16.msra.mxu0 %v3864_v54 }
0x123b   :  { %3274 = vmatprep.subr.mxu0 %v2754_v41 }
0x1302   :  { %v2112_v60 = vpop.f32.mrb[20].mxu1 }
0x1303   :  { %v3210_v50 = vpop.f32.mrb[21].mxu1  ;;  %3220 = vmatmul.mubr.msk.f32.vlgmr.msra.gmra.mrb[22].mxu1 %vm30_vm0, %v2112_v60 }
0x1304   :  { %3357 = vmatpush3.bf16.msra.mxu1 %v3354_v57  ;;  %3253 = vmatprep.mubr.msk.f32.mxu1 %vm1538_vm3, %v2443_v59  ;;  %v3228_v13 = vpop.f32.mrb[22].mxu0 }
0x1305   :  { %3251 = vmatprep.subr.mxu1 %v2459_v35  ;;  %v2263_v19 = vpop.f32.mrb[23].mxu0 }
0x1306   :  { %3244 = vmatprep.mubr.msk.f32.mxu0 %vm30_vm0, %v2263_v19 }
0x1307   :  { %3245 = vmatmul.mubr.msk.f32.vlgmr.msra.gmra.mrb[24].mxu0 %vm30_vm0, %v3228_v13  ;;  %vm2781_vm0 = vcmask 1047559  }
0x1308   :  { %3252 = vmatpush3.msra.mxu1 %v2459_v35  ;;  %3275 = vmatpush3.msra.mxu0 %v2754_v41 }
0x1309   :  { %3254 = vmatmul.mubr.msk.f32.vlgmr.msra.gmra.mrb[24].mxu1 %vm1538_vm3, %v2444_v1 }
0x130a   :  { %3256 = vmatprep.mubr.msk.f32.mxu1 %vm1538_vm3, %v2445_v39 }
0x130d   :  { %3257 = vmatmul.mubr.msk.f32.gmra.mrb[26].mxu1 %vm1538_vm3, %v2446_v2 }
0x130e   :  { %3259 = vmatprep.mubr.msk.f32.mxu1 %vm1538_vm3, %v2447_v3 }
0x1311   :  { %3260 = vmatmul.mubr.msk.f32.gmra.mrb[28].mxu1 %vm1538_vm3, %v2448_v14 }
0x1312   :  { %3262 = vmatprep.mubr.msk.f32.mxu1 %vm1538_vm3, %v2449_v15 }
0x1315   :  { %3263 = vmatmul.mubr.msk.f32.gmra.mrb[30].mxu1 %vm1538_vm3, %v2450_v16 }
0x1316   :  { %3265 = vmatprep.mubr.msk.f32.mxu1 %vm1538_vm3, %v2451_v18 }
0x1319   :  { %3266 = vmatmul.mubr.msk.f32.gmra.mrb[32].mxu1 %vm1538_vm3, %v2452_v63 }
0x131a   :  { %3268 = vmatprep.mubr.msk.f32.mxu1 %vm1538_vm3, %v2453_v4 }
0x131d   :  { %3269 = vmatmul.mubr.msk.f32.gmra.mrb[34].mxu1 %vm1538_vm3, %v2454_v5 }
0x131e   :  { %3271 = vmatprep.mubr.msk.f32.mxu1 %vm1538_vm3, %v2455_v6 }
0x1321   :  { %3272 = vmatmul.mubr.msk.f32.gmra.mrb[36].mxu1 %vm1538_vm3, %v2456_v7 }
0x13d6   :  { %v3964_v61 = vpop.f32.mrb[22].mxu1 }
0x13d7   :  { %v3221_v21 = vpop.f32.mrb[23].mxu1 }
0x13dc   :  { %v3255_v62 = vpop.f32.mrb[24].mxu1 }
0x13dd   :  { %v2579_v0 = vadd.f32 %v3255_v62, %v3969_v22  ;;  %v2573_v23 = vpop.f32.mrb[25].mxu1 }
0x13de   :  { %v2574_v24 = vadd.f32 %v3969_v22, %v2573_v23 }
0x13df   :  { %v2649_v33 = vsel %vm165_vm2, %v2579_v0, -inf }
0x13e0   :  { %v2650_v45 = vrot.slane %v2649_v33, 4  ;;  %v2642_v25 = vsel %vm165_vm2, %v2574_v24, -inf  ;;  %v3258_v26 = vpop.f32.mrb[26].mxu1 }
0x13e1   :  { %v2643_v27 = vrot.slane %v2642_v25, 4  ;;  %v2589_v28 = vadd.f32 %v3258_v26, %v3969_v22  ;;  %v2583_v29 = vpop.f32.mrb[27].mxu1 }
0x13e2   :  { %v2651_v30 = vmax.f32 %v2649_v33, %v2650_v45  ;;  %v2584_v31 = vadd.f32 %v3969_v22, %v2583_v29 }
0x13e3   :  { %v2644_v32 = vmax.f32 %v2642_v25, %v2643_v27  ;;  %v2663_v34 = vsel %vm165_vm2, %v2589_v28, -inf }
0x13e4   :  { %v2652_v37 = vrot.slane %v2651_v30, 2  ;;  %v2664_v38 = vrot.slane %v2663_v34, 4  ;;  %v2656_v40 = vsel %vm165_vm2, %v2584_v31, -inf  ;;  %v3261_v42 = vpop.f32.mrb[28].mxu1 }
0x13e5   :  { %v2645_v17 = vrot.slane %v2644_v32, 2  ;;  %v2657_v43 = vrot.slane %v2656_v40, 4  ;;  %v2599_v44 = vadd.f32 %v3261_v42, %v3969_v22  ;;  %v2593_v46 = vpop.f32.mrb[29].mxu1 }
0x13e6   :  { %v2653_v47 = vmax.f32 %v2651_v30, %v2652_v37  ;;  %v2665_v48 = vmax.f32 %v2663_v34, %v2664_v38  ;;  %v2594_v49 = vadd.f32 %v3969_v22, %v2593_v46 }
0x13e7   :  { %v2646_v20 = vmax.f32 %v2644_v32, %v2645_v17  ;;  %v2658_v51 = vmax.f32 %v2656_v40, %v2657_v43  ;;  %v2677_v52 = vsel %vm165_vm2, %v2599_v44, -inf }
0x13e8   :  { %v2654_v53 = vrot.slane %v2653_v47, 1  ;;  %v2666_v54 = vrot.slane %v2665_v48, 2  ;;  %v2678_v55 = vrot.slane %v2677_v52, 4  ;;  %v2670_v56 = vsel %vm165_vm2, %v2594_v49, -inf  ;;  %v3264_v57 = vpop.f32.mrb[30].mxu1 }
0x13e9   :  { %v2647_v58 = vrot.slane %v2646_v20, 1  ;;  %v2659_v36 = vrot.slane %v2658_v51, 2  ;;  %v2671_v59 = vrot.slane %v2670_v56, 4  ;;  %v2609_v60 = vadd.f32 %v3264_v57, %v3969_v22  ;;  %v2603_v35 = vpop.f32.mrb[31].mxu1 }
0x13ea   :  { %v2655_v50 = vmax.f32 %v2653_v47, %v2654_v53  ;;  %v2667_v1 = vmax.f32 %v2665_v48, %v2666_v54  ;;  %v2679_v39 = vmax.f32 %v2677_v52, %v2678_v55  ;;  %v2604_v2 = vadd.f32 %v3969_v22, %v2603_v35 }
0x13eb   :  { %v2648_v3 = vmax.f32 %v2646_v20, %v2647_v58  ;;  %v2660_v14 = vmax.f32 %v2658_v51, %v2659_v36  ;;  %v2672_v15 = vmax.f32 %v2670_v56, %v2671_v59  ;;  %v2691_v16 = vsel %vm165_vm2, %v2609_v60, -inf }
0x13ec   :  { %3453 = vtanh.f32 %v2655_v50  ;;  %v2668_v18 = vrot.slane %v2667_v1, 1  ;;  %v2680_v63 = vrot.slane %v2679_v39, 2  ;;  %v2692_v4 = vrot.slane %v2691_v16, 4  ;;  %v3267_v5 = vpop.f32.mrb[32].mxu1 }
0x13ed   :  { %3455 = vtanh.f32 %v2648_v3  ;;  %v2661_v6 = vrot.slane %v2660_v14, 1  ;;  %v2673_v7 = vrot.slane %v2672_v15, 2  ;;  %v2684_v8 = vsel %vm165_vm2, %v2604_v2, -inf  ;;  %v2613_v9 = vpop.f32.mrb[33].mxu1 }
0x13ee   :  { %v2669_v10 = vmax.f32 %v2667_v1, %v2668_v18  ;;  %v2681_v11 = vmax.f32 %v2679_v39, %v2680_v63  ;;  %v2693_v12 = vmax.f32 %v2691_v16, %v2692_v4  ;;  %v2685_v13 = vrot.slane %v2684_v8, 4 }
0x13ef   :  { %v2662_v19 = vmax.f32 %v2660_v14, %v2661_v6  ;;  %v2674_v41 = vmax.f32 %v2672_v15, %v2673_v7  ;;  %v2619_v21 = vadd.f32 %v3267_v5, %v3969_v22  ;;  %v2614_v62 = vadd.f32 %v3969_v22, %v2613_v9 }
0x13f0   :  { %3457 = vtanh.f32 %v2669_v10  ;;  %v2682_v0 = vrot.slane %v2681_v11, 1  ;;  %v2694_v23 = vrot.slane %v2693_v12, 2  ;;  %v2686_v24 = vmax.f32 %v2684_v8, %v2685_v13  ;;  %v3270_v33 = vpop.f32.mrb[34].mxu1 }
0x13f1   :  { %3459 = vtanh.f32 %v2662_v19  ;;  %v2675_v45 = vrot.slane %v2674_v41, 1  ;;  %v2705_v25 = vsel %vm165_vm2, %v2619_v21, -inf  ;;  %v2698_v26 = vsel %vm165_vm2, %v2614_v62, -inf  ;;  %v2623_v27 = vpop.f32.mrb[35].mxu1 }
0x13f2   :  { %v2683_v28 = vmax.f32 %v2681_v11, %v2682_v0  ;;  %v2695_v29 = vmax.f32 %v2693_v12, %v2694_v23  ;;  %v2687_v30 = vrot.slane %v2686_v24, 2  ;;  %v2706_v31 = vrot.slane %v2705_v25, 4 }
0x13f3   :  { %v2676_v32 = vmax.f32 %v2674_v41, %v2675_v45  ;;  %v2699_v34 = vrot.slane %v2698_v26, 4  ;;  %v2629_v37 = vadd.f32 %v3270_v33, %v3969_v22  ;;  %v2624_v38 = vadd.f32 %v3969_v22, %v2623_v27 }
0x13f4   :  { %3461 = vtanh.f32 %v2683_v28  ;;  %v2696_v40 = vrot.slane %v2695_v29, 1  ;;  %v2688_v42 = vmax.f32 %v2686_v24, %v2687_v30  ;;  %v2707_v17 = vmax.f32 %v2705_v25, %v2706_v31  ;;  %v3273_v43 = vpop.f32.mrb[36].mxu1 }
0x13f5   :  { %3463 = vtanh.f32 %v2676_v32  ;;  %v2700_v44 = vmax.f32 %v2698_v26, %v2699_v34  ;;  %v2719_v46 = vsel %vm165_vm2, %v2629_v37, -inf  ;;  %v2712_v47 = vsel %vm165_vm2, %v2624_v38, -inf  ;;  %v2633_v48 = vpop.f32.mrb[37].mxu1 }
0x13f6   :  { %v3454_v49 = vpop.eup %3453  ;;  %v2697_v20 = vmax.f32 %v2695_v29, %v2696_v40  ;;  %v2689_v51 = vrot.slane %v2688_v42, 1  ;;  %v2708_v52 = vrot.slane %v2707_v17, 2  ;;  %v2720_v53 = vrot.slane %v2719_v46, 4 }
0x13f7   :  { %v3456_v54 = vpop.eup %3455  ;;  %v2701_v55 = vrot.slane %v2700_v44, 2  ;;  %v2713_v56 = vrot.slane %v2712_v47, 4  ;;  %v2639_v57 = vadd.f32 %v3273_v43, %v3969_v22  ;;  %v2634_v58 = vadd.f32 %v3969_v22, %v2633_v48 }
0x13f8   :  { %3465 = vtanh.f32 %v2697_v20  ;;  %v2690_v36 = vmax.f32 %v2688_v42, %v2689_v51  ;;  %v2709_v59 = vmax.f32 %v2707_v17, %v2708_v52  ;;  %v2721_v60 = vmax.f32 %v2719_v46, %v2720_v53 }
0x13f9   :  { %v2702_v35 = vmax.f32 %v2700_v44, %v2701_v55  ;;  %v2714_v50 = vmax.f32 %v2712_v47, %v2713_v56  ;;  %v2733_v1 = vsel %vm165_vm2, %v2639_v57, -inf  ;;  %v2726_v39 = vsel %vm165_vm2, %v2634_v58, -inf }
0x13fa   :  { %v3458_v2 = vpop.eup %3457  ;;  %3467 = vtanh.f32 %v2690_v36  ;;  %v2710_v3 = vrot.slane %v2709_v59, 1  ;;  %v2722_v14 = vrot.slane %v2721_v60, 2  ;;  %v2734_v15 = vrot.slane %v2733_v1, 4 }
0x13fb   :  { %v3460_v16 = vpop.eup %3459  ;;  %v2703_v18 = vrot.slane %v2702_v35, 1  ;;  %v2715_v63 = vrot.slane %v2714_v50, 2  ;;  %v2727_v4 = vrot.slane %v2726_v39, 4  ;;  %v2770_v22 = vsel %vm2769_vm10, %v3454_v49, %v3456_v54 }
0x13fc   :  { %v2711_v5 = vmax.f32 %v2709_v59, %v2710_v3  ;;  %v2723_v6 = vmax.f32 %v2721_v60, %v2722_v14  ;;  %v2735_v7 = vmax.f32 %v2733_v1, %v2734_v15  ;;  %v2772_v8 = vsel %vm2771_vm11, %v3460_v16, %v2770_v22 }
0x13fd   :  { %v2704_v9 = vmax.f32 %v2702_v35, %v2703_v18  ;;  %v2716_v10 = vmax.f32 %v2714_v50, %v2715_v63  ;;  %v2728_v11 = vmax.f32 %v2726_v39, %v2727_v4  ;;  %v2774_v12 = vsel %vm2773_vm12, %v3458_v2, %v2772_v8 }
0x13fe   :  { %v3462_v13 = vpop.eup %3461  ;;  %3469 = vtanh.f32 %v2711_v5  ;;  %v2724_v19 = vrot.slane %v2723_v6, 1  ;;  %v2736_v41 = vrot.slane %v2735_v7, 2  ;;  %v2870_v51 = vrot.slane %v3964_v61, 2 }
0x13ff   :  { %v3464_v21 = vpop.eup %3463  ;;  %3471 = vtanh.f32 %v2704_v9  ;;  %v2717_v62 = vrot.slane %v2716_v10, 1  ;;  %v2729_v0 = vrot.slane %v2728_v11, 2 }
0x1400   :  { %v2725_v23 = vmax.f32 %v2723_v6, %v2724_v19  ;;  %v2737_v24 = vmax.f32 %v2735_v7, %v2736_v41  ;;  %v2776_v33 = vsel %vm2775_vm13, %v3464_v21, %v2774_v12 }
0x1401   :  { %v2718_v45 = vmax.f32 %v2716_v10, %v2717_v62  ;;  %v2730_v25 = vmax.f32 %v2728_v11, %v2729_v0  ;;  %v2778_v26 = vsel %vm2777_vm14, %v3462_v13, %v2776_v33 }
0x1402   :  { %v3466_v27 = vpop.eup %3465  ;;  %v2738_v28 = vrot.slane %v2737_v24, 1 }
0x1403   :  { %3473 = vtanh.f32 %v2718_v45  ;;  %v2731_v29 = vrot.slane %v2730_v25, 1 }
0x1404   :  { %v3468_v30 = vpop.eup %3467  ;;  %3475 = vtanh.f32 %v2725_v23  ;;  %v2739_v31 = vmax.f32 %v2737_v24, %v2738_v28 }
0x1405   :  { %v2732_v32 = vmax.f32 %v2730_v25, %v2731_v29  ;;  %v2780_v34 = vsel %vm2779_vm15, %v3468_v30, %v2778_v26 }
0x1406   :  { %v2782_v37 = vsel %vm2781_vm0, %v3466_v27, %v2780_v34 }
0x1407   :  { %3477 = vtanh.f32 %v2732_v32  ;;  %3276 = vmatprep.mubr.msk.f32.mxu0 %vm165_vm2, %v2782_v37 }
0x1408   :  { %v3470_v38 = vpop.eup %3469  ;;  %3479 = vtanh.f32 %v2739_v31 }
0x1409   :  { %v3472_v40 = vpop.eup %3471 }
0x140a   :  { %v2783_v42 = vsel %vm2769_vm10, %v3470_v38, %v3472_v40 }
0x140d   :  { %v3474_v17 = vpop.eup %3473 }
0x140e   :  { %v3476_v43 = vpop.eup %3475  ;;  %v2784_v44 = vsel %vm2771_vm11, %v3474_v17, %v2783_v42 }
0x140f   :  { %v2785_v46 = vsel %vm2773_vm12, %v3476_v43, %v2784_v44 }
0x1411   :  { %v3478_v47 = vpop.eup %3477 }
0x1412   :  { %v3480_v48 = vpop.eup %3479  ;;  %v2786_v49 = vsel %vm2775_vm13, %v3478_v47, %v2785_v46 }
0x1413   :  { %v2787_v20 = vsel %vm2777_vm14, %v3480_v48, %v2786_v49 }
0x1414   :  { %3277 = vmatmul.mubr.msk.f32.vlgmr.msra.gmra.mrb[24].mxu0 %vm165_vm2, %v2787_v20 }
0x14e7   :  { %v3278_v52 = vpop.f32.mrb[24].mxu0 }
0x14e8   :  { %v2873_v53 = vsel %vm2872_vm1, %v3278_v52, %v2870_v51  ;;  %v2858_v54 = vpop.f32.mrb[25].mxu0 }
0x14e9   :  { %2874 = vst [vmem:[%s4025_s7] sm:$0xff] %v2858_v54  ;;  %2875 = vst [vmem:[%s4025_s7 + $0x8] sm:$0xff] %v2873_v53 }

</bundles_post_ra>
